<compile_context>
chip_gen: v7x
topology: tpu7x:2x2x1
jax: 0.10.0
libtpu: 0.0.40
codegen_flags: <defaults>
</compile_context>

<pallas_src>
import functools

import jax
import jax.numpy as jnp
from jax.experimental import pallas as pl
from jax.experimental.pallas import tpu as pltpu


def _round_up(n, m):
    return ((n + m - 1) // m) * m


def _disc_mlp_kernel(x_ref, w1_ref, b1_ref, w2_ref, b2_ref, w3_ref, b3_ref,
                     o_ref, *, h1_chunk, slope):
    """One batch tile of the discriminator MLP.

    x_ref  : [bm, d_pad] bf16  layer-1 input, one-hot label pre-baked into the
                               lanes past image_dim by the wrapper.
    w1_ref : [d_pad, H1] bf16  combined layer-1 weight (embedding folded in).
    b1_ref : [1, H1]     f32
    w2_ref : [H1, H2]    bf16
    b2_ref : [1, H2]     f32
    w3_ref : [1, H2]     f32   final layer as a row (out_features == 1).
    b3_ref : [1, 1]      f32   SMEM scalar.
    o_ref  : [8, bm]     f32   lane-dense sigmoid row, replicated on sublanes.
    """
    bm = x_ref.shape[0]
    h1_dim = w1_ref.shape[1]
    h2_dim = w2_ref.shape[1]

    x = x_ref[...]                                     # [bm, d_pad] bf16

    # Layers 1 + 2 fused over H1 chunks: keeps the live f32 intermediate at
    # [bm, chunk] instead of spilling a full [bm, H1] f32 h1 to VMEM and
    # re-loading it for the cast + second matmul.
    n_chunks = max(1, h1_dim // h1_chunk)
    if h1_dim % n_chunks != 0:
        n_chunks = 1
    chunk = h1_dim // n_chunks

    h2 = jnp.zeros((bm, h2_dim), jnp.float32)
    for c in range(n_chunks):                          # static unroll (2 chunks)
        lo, hi = c * chunk, (c + 1) * chunk
        h1_c = jnp.dot(x, w1_ref[:, lo:hi],            # bf16 MXU, f32 acc
                       preferred_element_type=jnp.float32)
        h1_c = h1_c + b1_ref[:, lo:hi]
        h1_c = jnp.where(h1_c > 0, h1_c, slope * h1_c)           # LeakyReLU
        h2 = h2 + jnp.dot(h1_c.astype(w2_ref.dtype), w2_ref[lo:hi, :],
                          preferred_element_type=jnp.float32)

    h2 = h2 + b2_ref[...]
    h2 = jnp.where(h2 > 0, h2, slope * h2)                        # LeakyReLU

    # Final layer (out_features == 1): contract h2's feature axis against the
    # w3 row so the batch ends up on lanes (the q @ k.T dot_general pattern),
    # producing a lane-dense [1, bm] logit row directly.  b3 is an SMEM scalar.
    logit_row = jax.lax.dot_general(
        w3_ref[...], h2, (((1,), (1,)), ((), ())),
        preferred_element_type=jnp.float32) + b3_ref[0, 0]        # [1, bm]
    row = jax.nn.sigmoid(logit_row)                               # [1, bm]

    # Replicate across 8 sublanes so the (8, bm) output block keeps the block
    # second-minor 8-aligned and every store is a full, unmasked lane-dense
    # vector store (the extra ~8x writeback is a few KB).
    o_ref[...] = jnp.broadcast_to(row, (8, bm)).astype(o_ref.dtype)


def prepare_params(params):
    """One-time, per-model weight preprocessing (hoisted out of the forward).

    Folds the embedding lookup + concat into the first matmul:
        [x, embed[y]] @ w1 == x @ w1[:D] + onehot(y) @ (embed @ w1[D:])
    and produces bf16 MXU operands / lane-aligned shapes.
    """
    embed = params["embed"].astype(jnp.float32)        # [C, C]
    w1 = params["w1"].astype(jnp.float32)              # [D + C, H1]
    b1 = params["b1"].astype(jnp.float32)              # [1, H1]
    w2 = params["w2"].astype(jnp.float32)              # [H1, H2]
    b2 = params["b2"].astype(jnp.float32)              # [1, H2]
    w3 = params["w3"].astype(jnp.float32)              # [H2, 1]
    b3 = params["b3"].astype(jnp.float32)              # [1, 1]

    num_classes = embed.shape[0]
    d_in, h1_dim = w1.shape
    image_dim = d_in - num_classes
    h2_dim = w2.shape[1]
    d_pad = _round_up(d_in, 128)                       # lane-aligned input width

    table = embed @ w1[image_dim:]                     # [C, H1]
    w1c = jnp.zeros((d_pad, h1_dim), jnp.float32)
    w1c = w1c.at[:image_dim].set(w1[:image_dim])
    w1c = w1c.at[image_dim:d_in].set(table)

    return dict(
        w1c=w1c.astype(jnp.bfloat16),                  # [d_pad, H1] bf16
        b1=b1.reshape(1, h1_dim),
        w2=w2.astype(jnp.bfloat16),                    # [H1, H2] bf16
        b2=b2.reshape(1, h2_dim),
        w3_row=w3.reshape(1, h2_dim),                  # [1, H2] f32
        b3=b3.reshape(1, 1),                           # SMEM scalar
    )


def discriminator_forward(x, y, prepared, *, block_m=512):
    """x: [B, image_dim] float32, y: [B] int labels -> [B, 1] float32."""
    w1c, b1 = prepared["w1c"], prepared["b1"]
    w2, b2 = prepared["w2"], prepared["b2"]
    w3_row, b3 = prepared["w3_row"], prepared["b3"]

    B, image_dim = x.shape
    d_pad, h1_dim = w1c.shape
    h2_dim = w2.shape[1]

    # ---- batch tiling ------------------------------------------------------
    # Few, large tiles (amortize per-grid-step overhead) but >= 2 tiles once
    # the batch is big enough for v7x's two TensorCores, and tiles rounded to
    # 8 rows only so padding waste stays < 8 * n_tiles rows.
    n_tiles = pl.cdiv(B, block_m)
    if B >= 128:
        n_tiles = max(n_tiles, 2)
    bm = _round_up(pl.cdiv(B, n_tiles), 8)
    b_pad = n_tiles * bm

    # ---- layer-1 input: [x | onehot(y)] built directly in bf16 --------------
    onehot = jax.nn.one_hot(y, d_pad - image_dim, dtype=jnp.bfloat16)
    h_in = jnp.concatenate([x.astype(jnp.bfloat16), onehot], axis=1)  # [B, d_pad]
    x_pad = jnp.zeros((b_pad, d_pad), jnp.bfloat16).at[:B].set(h_in)

    kernel = functools.partial(_disc_mlp_kernel, h1_chunk=256, slope=0.2)

    out = pl.pallas_call(
        kernel,
        out_shape=jax.ShapeDtypeStruct((n_tiles * 8, bm), jnp.float32),
        grid=(n_tiles,),
        in_specs=[
            pl.BlockSpec((bm, d_pad), lambda i: (i, 0)),         # x tile (streamed)
            pl.BlockSpec((d_pad, h1_dim), lambda i: (0, 0)),     # w1c (resident)
            pl.BlockSpec((1, h1_dim), lambda i: (0, 0)),         # b1  (resident)
            pl.BlockSpec((h1_dim, h2_dim), lambda i: (0, 0)),    # w2  (resident)
            pl.BlockSpec((1, h2_dim), lambda i: (0, 0)),         # b2  (resident)
            pl.BlockSpec((1, h2_dim), lambda i: (0, 0)),         # w3 row (resident)
            pl.BlockSpec(memory_space=pltpu.MemorySpace.SMEM),   # b3 scalar
        ],
        out_specs=pl.BlockSpec((8, bm), lambda i: (i, 0)),       # lane-dense rows
        compiler_params=pltpu.CompilerParams(
            dimension_semantics=("parallel",),
        ),
    )(x_pad, w1c, b1, w2, b2, w3_row, b3)

    # The 8 sublane rows of each tile block are identical; keep row 0 per tile.
    out = out.reshape(n_tiles, 8, bm)[:, 0, :].reshape(b_pad, 1)
    return out[:B]


def init_params(key, image_dim, num_classes):
    """Deterministic parameter init mirroring the PyTorch module's shapes."""
    d_in = image_dim + num_classes
    ks = jax.random.split(key, 7)

    def lin(kw, kb, fan_in, fan_out):
        bound = 1.0 / jnp.sqrt(fan_in)
        w = jax.random.uniform(kw, (fan_in, fan_out), jnp.float32, -bound, bound)
        b = jax.random.uniform(kb, (1, fan_out), jnp.float32, -bound, bound)
        return w, b

    embed = jax.random.normal(ks[0], (num_classes, num_classes), jnp.float32)
    w1, b1 = lin(ks[1], ks[2], d_in, 512)
    w2, b2 = lin(ks[3], ks[4], 512, 256)
    w3, b3 = lin(ks[5], ks[6], 256, 1)
    return dict(embed=embed, w1=w1, b1=b1, w2=w2, b2=b2, w3=w3, b3=b3)


if __name__ == "__main__":
    # image_dim + num_classes = 128 (lane aligned); batch=300 exercises the
    # multi-tile grid (2 tiles of 152 rows) and the 8-row padding path.
    IMAGE_DIM = 118
    NUM_CLASSES = 10
    BATCH = 300

    key = jax.random.PRNGKey(0)
    k_x, k_y, k_p = jax.random.split(key, 3)

    x = jax.random.normal(k_x, (BATCH, IMAGE_DIM), jnp.float32)
    y = jax.random.randint(k_y, (BATCH,), 0, NUM_CLASSES, jnp.int32)
    params = init_params(k_p, IMAGE_DIM, NUM_CLASSES)

    # Weight prep is done once, outside the per-call forward.
    prepared = prepare_params(params)
    forward = jax.jit(discriminator_forward)

    out = jax.block_until_ready(forward(x, y, prepared))

    # Pure-JAX f32 reference of the original PyTorch module.
    y_emb = jnp.take(params["embed"], y, axis=0)
    h = jnp.concatenate([x, y_emb], axis=1)
    h = h @ params["w1"] + params["b1"]
    h = jnp.where(h > 0, h, 0.2 * h)
    h = h @ params["w2"] + params["b2"]
    h = jnp.where(h > 0, h, 0.2 * h)
    ref = jax.nn.sigmoid(h @ params["w3"] + params["b3"])

    assert out.shape == (BATCH, 1), out.shape
    err = float(jnp.max(jnp.abs(out - ref)))
    # bf16 matmul inputs (f32 accumulation) -> allow bf16-level slack.
    assert err < 1e-2, err
    print("KERNEL_OK")
</pallas_src>

<mosaic_0001>
module attributes {stable_mosaic.version = 11 : i64} {
  func.func @_disc_mlp_kernel(%arg0: i32, %arg1: memref<152x128xbf16, #tpu.memory_space<vmem>>, %arg2: memref<128x512xbf16, #tpu.memory_space<vmem>>, %arg3: memref<1x512xf32, #tpu.memory_space<vmem>>, %arg4: memref<512x256xbf16, #tpu.memory_space<vmem>>, %arg5: memref<1x256xf32, #tpu.memory_space<vmem>>, %arg6: memref<1x256xf32, #tpu.memory_space<vmem>>, %arg7: memref<1x1xf32, #tpu.memory_space<smem>>, %arg8: memref<8x152xf32, #tpu.memory_space<vmem>>) attributes {dimension_semantics = [#tpu.dimension_semantics<parallel>], iteration_bounds = array<i64: 2>, scalar_prefetch = 0 : i64, scratch_operands = 0 : i64, tpu.core_type = #tpu.core_type<tc>, window_params = [{transform_indices = @transform_0, window_bounds = array<i64: 152, 128>}, {pipeline_mode = #tpu.pipeline_mode<synchronous>, transform_indices = @transform_1, window_bounds = array<i64: 128, 512>}, {pipeline_mode = #tpu.pipeline_mode<synchronous>, transform_indices = @transform_2, window_bounds = array<i64: 1, 512>}, {pipeline_mode = #tpu.pipeline_mode<synchronous>, transform_indices = @transform_3, window_bounds = array<i64: 512, 256>}, {pipeline_mode = #tpu.pipeline_mode<synchronous>, transform_indices = @transform_4, window_bounds = array<i64: 1, 256>}, {pipeline_mode = #tpu.pipeline_mode<synchronous>, transform_indices = @transform_5, window_bounds = array<i64: 1, 256>}, {transform_indices = @transform_6, window_bounds = array<i64: 1, 1>}, {transform_indices = @transform_7, window_bounds = array<i64: 8, 152>}]} {
    %c0 = arith.constant 0 : index
    %c0_0 = arith.constant 0 : index
    %0 = vector.load %arg1[%c0, %c0_0] : memref<152x128xbf16, #tpu.memory_space<vmem>>, vector<152x128xbf16>
    %cst = arith.constant 0.000000e+00 : f32
    %1 = vector.broadcast %cst : f32 to vector<152x256xf32>
    %c0_1 = arith.constant 0 : index
    %c0_2 = arith.constant 0 : index
    %2 = vector.load %arg2[%c0_1, %c0_2] : memref<128x512xbf16, #tpu.memory_space<vmem>>, vector<128x256xbf16>
    %cst_3 = arith.constant dense<0.000000e+00> : vector<152x256xf32>
    %3 = tpu.matmul %0, %2, %cst_3 {dimension_numbers = #tpu.dot_dimension_numbers<[1], [0], [0], [1], [0, 0, 1, 1], [], []>} : vector<152x128xbf16>, vector<128x256xbf16>, vector<152x256xf32> -> vector<152x256xf32>
    %c0_4 = arith.constant 0 : index
    %c0_5 = arith.constant 0 : index
    %4 = vector.load %arg3[%c0_4, %c0_5] : memref<1x512xf32, #tpu.memory_space<vmem>>, vector<1x256xf32>
    %5 = vector.broadcast %4 : vector<1x256xf32> to vector<152x256xf32>
    %6 = arith.addf %3, %5 : vector<152x256xf32>
    %cst_6 = arith.constant 0.000000e+00 : f32
    %7 = vector.broadcast %cst_6 : f32 to vector<152x256xf32>
    %8 = arith.cmpf ogt, %6, %7 : vector<152x256xf32>
    %cst_7 = arith.constant 2.000000e-01 : f32
    %9 = vector.broadcast %cst_7 : f32 to vector<152x256xf32>
    %10 = arith.mulf %9, %6 : vector<152x256xf32>
    %11 = arith.select %8, %6, %10 : vector<152x256xi1>, vector<152x256xf32>
    %12 = arith.truncf %11 : vector<152x256xf32> to vector<152x256xbf16>
    %c0_8 = arith.constant 0 : index
    %c0_9 = arith.constant 0 : index
    %13 = vector.load %arg4[%c0_8, %c0_9] : memref<512x256xbf16, #tpu.memory_space<vmem>>, vector<256x256xbf16>
    %cst_10 = arith.constant dense<0.000000e+00> : vector<152x256xf32>
    %14 = tpu.matmul %12, %13, %cst_10 {dimension_numbers = #tpu.dot_dimension_numbers<[1], [0], [0], [1], [0, 0, 1, 1], [], []>} : vector<152x256xbf16>, vector<256x256xbf16>, vector<152x256xf32> -> vector<152x256xf32>
    %15 = arith.addf %1, %14 : vector<152x256xf32>
    %c0_11 = arith.constant 0 : index
    %c256 = arith.constant 256 : index
    %16 = vector.load %arg2[%c0_11, %c256] : memref<128x512xbf16, #tpu.memory_space<vmem>>, vector<128x256xbf16>
    %cst_12 = arith.constant dense<0.000000e+00> : vector<152x256xf32>
    %17 = tpu.matmul %0, %16, %cst_12 {dimension_numbers = #tpu.dot_dimension_numbers<[1], [0], [0], [1], [0, 0, 1, 1], [], []>} : vector<152x128xbf16>, vector<128x256xbf16>, vector<152x256xf32> -> vector<152x256xf32>
    %c0_13 = arith.constant 0 : index
    %c256_14 = arith.constant 256 : index
    %18 = vector.load %arg3[%c0_13, %c256_14] : memref<1x512xf32, #tpu.memory_space<vmem>>, vector<1x256xf32>
    %19 = vector.broadcast %18 : vector<1x256xf32> to vector<152x256xf32>
    %20 = arith.addf %17, %19 : vector<152x256xf32>
    %cst_15 = arith.constant 0.000000e+00 : f32
    %21 = vector.broadcast %cst_15 : f32 to vector<152x256xf32>
    %22 = arith.cmpf ogt, %20, %21 : vector<152x256xf32>
    %cst_16 = arith.constant 2.000000e-01 : f32
    %23 = vector.broadcast %cst_16 : f32 to vector<152x256xf32>
    %24 = arith.mulf %23, %20 : vector<152x256xf32>
    %25 = arith.select %22, %20, %24 : vector<152x256xi1>, vector<152x256xf32>
    %26 = arith.truncf %25 : vector<152x256xf32> to vector<152x256xbf16>
    %c256_17 = arith.constant 256 : index
    %c0_18 = arith.constant 0 : index
    %27 = vector.load %arg4[%c256_17, %c0_18] : memref<512x256xbf16, #tpu.memory_space<vmem>>, vector<256x256xbf16>
    %cst_19 = arith.constant dense<0.000000e+00> : vector<152x256xf32>
    %28 = tpu.matmul %26, %27, %cst_19 {dimension_numbers = #tpu.dot_dimension_numbers<[1], [0], [0], [1], [0, 0, 1, 1], [], []>} : vector<152x256xbf16>, vector<256x256xbf16>, vector<152x256xf32> -> vector<152x256xf32>
    %29 = arith.addf %15, %28 : vector<152x256xf32>
    %c0_20 = arith.constant 0 : index
    %c0_21 = arith.constant 0 : index
    %30 = vector.load %arg5[%c0_20, %c0_21] : memref<1x256xf32, #tpu.memory_space<vmem>>, vector<1x256xf32>
    %31 = vector.broadcast %30 : vector<1x256xf32> to vector<152x256xf32>
    %32 = arith.addf %29, %31 : vector<152x256xf32>
    %cst_22 = arith.constant 0.000000e+00 : f32
    %33 = vector.broadcast %cst_22 : f32 to vector<152x256xf32>
    %34 = arith.cmpf ogt, %32, %33 : vector<152x256xf32>
    %cst_23 = arith.constant 2.000000e-01 : f32
    %35 = vector.broadcast %cst_23 : f32 to vector<152x256xf32>
    %36 = arith.mulf %35, %32 : vector<152x256xf32>
    %37 = arith.select %34, %32, %36 : vector<152x256xi1>, vector<152x256xf32>
    %c0_24 = arith.constant 0 : index
    %c0_25 = arith.constant 0 : index
    %38 = vector.load %arg6[%c0_24, %c0_25] : memref<1x256xf32, #tpu.memory_space<vmem>>, vector<1x256xf32>
    %cst_26 = arith.constant dense<0.000000e+00> : vector<1x152xf32>
    %39 = tpu.matmul %38, %37, %cst_26 {dimension_numbers = #tpu.dot_dimension_numbers<[1], [1], [0], [0], [0, 0, 1, 0], [], []>} : vector<1x256xf32>, vector<152x256xf32>, vector<1x152xf32> -> vector<1x152xf32>
    %c0_27 = arith.constant 0 : index
    %c0_28 = arith.constant 0 : index
    %40 = memref.load %arg7[%c0_27, %c0_28] : memref<1x1xf32, #tpu.memory_space<smem>>
    %41 = vector.broadcast %40 : f32 to vector<1x152xf32>
    %42 = arith.addf %39, %41 : vector<1x152xf32>
    %43 = arith.negf %42 : vector<1x152xf32>
    %44 = math.exp %43 : vector<1x152xf32>
    %cst_29 = arith.constant 1.000000e+00 : f32
    %45 = vector.broadcast %cst_29 : f32 to vector<1x152xf32>
    %46 = arith.addf %45, %44 : vector<1x152xf32>
    %47 = arith.divf %45, %46 : vector<1x152xf32>
    %48 = vector.shape_cast %47 : vector<1x152xf32> to vector<1x152xf32>
    %49 = vector.broadcast %48 : vector<1x152xf32> to vector<8x152xf32>
    %c0_30 = arith.constant 0 : index
    %c0_31 = arith.constant 0 : index
    %50 = vector.load %arg8[%c0_30, %c0_31] : memref<8x152xf32, #tpu.memory_space<vmem>>, vector<8x152xf32>
    tpu.vector_store %arg8[%c0_30, %c0_31], %49 {strides = array<i32>} : memref<8x152xf32, #tpu.memory_space<vmem>>, vector<8x152xf32>,
    return
  }
  func.func @transform_0(%arg0: i32) -> (i32, i32) {
    %c0_i32 = arith.constant 0 : i32
    %c0_i32_0 = arith.constant 0 : i32
    return %arg0, %c0_i32 : i32, i32
  }
  func.func @transform_1(%arg0: i32) -> (i32, i32) {
    %c0_i32 = arith.constant 0 : i32
    %c0_i32_0 = arith.constant 0 : i32
    %c0_i32_1 = arith.constant 0 : i32
    return %c0_i32, %c0_i32_0 : i32, i32
  }
  func.func @transform_2(%arg0: i32) -> (i32, i32) {
    %c0_i32 = arith.constant 0 : i32
    %c0_i32_0 = arith.constant 0 : i32
    %c0_i32_1 = arith.constant 0 : i32
    return %c0_i32, %c0_i32_0 : i32, i32
  }
  func.func @transform_3(%arg0: i32) -> (i32, i32) {
    %c0_i32 = arith.constant 0 : i32
    %c0_i32_0 = arith.constant 0 : i32
    %c0_i32_1 = arith.constant 0 : i32
    return %c0_i32, %c0_i32_0 : i32, i32
  }
  func.func @transform_4(%arg0: i32) -> (i32, i32) {
    %c0_i32 = arith.constant 0 : i32
    %c0_i32_0 = arith.constant 0 : i32
    %c0_i32_1 = arith.constant 0 : i32
    return %c0_i32, %c0_i32_0 : i32, i32
  }
  func.func @transform_5(%arg0: i32) -> (i32, i32) {
    %c0_i32 = arith.constant 0 : i32
    %c0_i32_0 = arith.constant 0 : i32
    %c0_i32_1 = arith.constant 0 : i32
    return %c0_i32, %c0_i32_0 : i32, i32
  }
  func.func @transform_6(%arg0: i32) -> (i32, i32) {
    %c0_i32 = arith.constant 0 : i32
    %c0_i32_0 = arith.constant 0 : i32
    %c0_i32_1 = arith.constant 0 : i32
    return %c0_i32, %c0_i32_0 : i32, i32
  }
  func.func @transform_7(%arg0: i32) -> (i32, i32) {
    %c0_i32 = arith.constant 0 : i32
    %c0_i32_0 = arith.constant 0 : i32
    return %arg0, %c0_i32 : i32, i32
  }
}

</mosaic_0001>

<bundles_post_ra>
// kernel: squeeze.1
= control target key start
LH: loop header
LB: loop body
LE: loop exit
PB: predicated region body
PF: predicated region fallthrough
CT: control target
= control target key end

     0   :  { %s124_s0 = inlined_call_operand.vmem [shape: f32[2,152], index: 0, kind: input, shape index: {}]   ;;  %s125_s1 = inlined_call_operand.hbm [shape: f32[304,1], index: 1, kind: output, shape index: {}]  }
   0x1   :  { %v67_v0 = vld [vmem:[%s124_s0 + $0x2] sm:$0x3]  ;;  %v9_v1 = vld [vmem:[%s124_s0] sm:$0x3] }
   0x2   :  { %8 = vst [vmem:[#allocation3 + $0x8] sm:$0x3] %v67_v0  ;;  %10 = vst [vmem:[#allocation3] sm:$0x3] %v9_v1 }
   0x3   :  { %2 = vsyncpa [#allocation1], 0  ;;  %vm22_vm0 = vcmask 850944   ;;  %vm13_vm1 = vcmask 195584   ;;  %s94_s0 = smov 24   ;;  %vm29_vm2 = vcmask 392384  }
   0x4   :  { %vm36_vm3 = vcmask 1047744   ;;  %s95_s10 = smov [#allocation0]  }
   0x5   :  { %s60_s11 = sshll.u32 %s95_s10, 4  ;;  %s61_s11 = int_to_ptr.vmem [resolvable:$true] %s60_s11 }
   0x6   :  { %s70_s12 = scalar_lea.vmem %s61_s11, 48  ;;  %s74_s13 = scalar_lea.vmem %s61_s11, 64 }
   0x7   :  { %p71_p0 = scmp.ne.s32.totalorder %s61_s11, %s70_s12  ;;  %p75_p1 = scmp.lt.s32.totalorder %s61_s11, %s61_s11 }
   0x8   :  { %p76_p2 = scmp.lt.s32.totalorder %s74_s13, %s70_s12 }
   0x9   :  { %v19_v2 = vld [vmem:[#allocation3 + $0x1] sm:$0x1]   ;;  %v21_v3 = vld [vmem:[#allocation3 + $0x9] sm:$0x1]   ;;  %v12_v5 = vld [vmem:[#allocation3 + $0x8] sm:$0x1]  }
   0xa   :  { %v23_v4 = vsel %vm22_vm0, %v21_v3, %v19_v2  ;;  %v16_v6 = vld [vmem:[#allocation3] sm:$0x1]   ;;  %15 = vst.msk [vmem:[#allocation2 + $0x8] sm:$0x1] %vm13_vm1, %v12_v5   ;;  %v33_v7 = vld [vmem:[#allocation3 + $0x1] sm:$0x1]   ;;  %p77_p3 = por %p76_p2, %p75_p1 }
   0xb   :  { %24 = vrot.lane.b32.xlu0 %v23_v4, %s94_s0  ;;  %17 = vst [vmem:[#allocation2] sm:$0x1] %v16_v6  }
   0xc   :  { %p78_p4 = pnand %p77_p3, %p71_p0 }
   0xf   :  { %34 = vrot.lane.b32.xlu0 %v33_v7, %s94_s0 }
  0x12   :  { %v42_v8 = vld [vmem:[#allocation2] sm:$0x1] }
  0x13   :  { %44 = vst [vmem:[#allocation0] sm:$0x1] %v42_v8 }
  0x7d   :  { %v25_v9 = vpop.permute.xlu0 %24  }
  0x7e   :  { %28 = vst.msk [vmem:[#allocation2 + $0x10] sm:$0x1] %vm13_vm1, %v25_v9  }
  0x7f   :  { %31 = vst.msk [vmem:[#allocation2 + $0x10] sm:$0x1] %vm29_vm2, %v25_v9  }
  0x81   :  { %v35_v10 = vpop.permute.xlu0 %34  }
  0x82   :  { %38 = vst.msk [vmem:[#allocation2 + $0x8] sm:$0x1] %vm36_vm3, %v35_v10  }
  0x86   :  { %v51_v11 = vld [vmem:[#allocation2 + $0x10] sm:$0x1] }
  0x87   :  { %55 = vst [vmem:[#allocation0 + $0x2] sm:$0x1] %v51_v11 }
  0x89   :  { %v46_v12 = vld [vmem:[#allocation2 + $0x8] sm:$0x1] }
  0x8a   :  { %49 = vst [vmem:[#allocation0 + $0x1] sm:$0x1] %v46_v12 }
  0x8b   :  { %81 = shalt.err (!%p78_p4)
}
  0x8c   :  { %s82_s16 = scalar_lea.hbm %s125_s1, 48 }
  0x8d   :  { %p83_p5 = scmp.ne.s32.totalorder %s125_s1, %s82_s16  ;;  %p86_p6 = scmp.lt.u32.totalorder %s82_s16, %s125_s1 }
  0x8f   :  { %p88_p7 = pnand %p86_p6, %p83_p5 }
  0x91   :  { %91 = shalt.err (!%p88_p7)
}
  0x92   :  { %63 = dma.vmem_to_hbm [thread:$0]  %s61_s11, 48, %s125_s1, [#allocation1]  }
  0x93   :  { %92 = dma.done.wait [#allocation1], 48  }
  0x94   :  { %93 = vsyncadd [#allocation1], 4294967248 }
  0x95   :  { %65 = vsyncpa [#allocation1], 1 }

// kernel: discriminator_forward.1
= control target key start
LH: loop header
LB: loop body
LE: loop exit
PB: predicated region body
PF: predicated region fallthrough
CT: control target
= control target key end

     0   :  { %s2493_s26 = smov 0   ;;  %s3241_s0 = inlined_call_operand.vmem [shape: bf16[304,128], index: 0, kind: input, shape index: {}]   ;;  %s3242_s1 = inlined_call_operand.vmem [shape: bf16[128,512], index: 1, kind: input, shape index: {}]   ;;  %s3243_s2 = inlined_call_operand.vmem [shape: f32[1,512], index: 2, kind: input, shape index: {}]   ;;  %s3244_s3 = inlined_call_operand.vmem [shape: bf16[512,256], index: 3, kind: input, shape index: {}]   ;;  %s3245_s4 = inlined_call_operand.vmem [shape: f32[1,256], index: 4, kind: input, shape index: {}]   ;;  %s3246_s5 = inlined_call_operand.vmem [shape: f32[1,256], index: 5, kind: input, shape index: {}]   ;;  %s3247_s6 = inlined_call_operand.<no memory space> [shape: f32[1,1], index: 6, kind: input, shape index: {}]   ;;  %s3248_s7 = inlined_call_operand.vmem [shape: f32[16,152], index: 7, kind: output, shape index: {}]  }
   0x1   :  { %12 = sst [smem:[#allocation2]] %s3247_s6 }
   0x2 LB: > { %s2499_s27 = sadd.s32 4294967295, %s2447_s26   ;;  %p2083_p0 = scmp.ge.s32.totalorder %s2447_s26, 1  ;;  %s2447_s26 = sphi %s2493_s26, %s18_s26  }
   0x3   : > { %p239_p1 = scmp.lt.s32.totalorder %s2447_s26, 3 }
   0x5   : > { %p240_p2 = pnand %p2083_p0, %p239_p1 }
   0x6   : > { %v2279_v0 = vld [vmem:[%s3242_s1 + $0x4] ss:$16 sps:$4 sm:$0xff] (!%p240_p2)   ;;  %v2281_v1 = vld [vmem:[%s3242_s1 + $0xc] ss:$16 sps:$4 sm:$0xff] (!%p240_p2)   ;;  %v2449_v2 = vmov (!%p240_p2), 0   ;;  %s271_s20 = smul.u32 (!%p240_p2), 19, %s2499_s27 }
   0x7   : > { %243 = sbr.rel (%p240_p2) target bundleno = 820 (0x334), region = 48  ;;  %500 = vmatprep.mubr.bf16.mxu0 (!%p240_p2), %v2449_v2  ;;  %905 = vmatprep.mubr.bf16.mxu1 (!%p240_p2), %v2449_v2  ;;  %v2283_v3 = vld [vmem:[%s3242_s1] ss:$16 sps:$4 sm:$0xff] (!%p240_p2)   ;;  %v2284_v4 = vld [vmem:[%s3242_s1 + $0x8] ss:$16 sps:$4 sm:$0xff] (!%p240_p2)   ;;  %s1917_s16 = sld [smem:[#allocation2]] (!%p240_p2) }
   0x8   : > { %468 = vmatprep.subr.bf16.mxu0 (!%p240_p2), %v2279_v0  ;;  %873 = vmatprep.subr.bf16.mxu1 (!%p240_p2), %v2281_v1  ;;  %v2285_v5 = vld [vmem:[%s3242_s1 + $0x24] ss:$16 sps:$4 sm:$0xff] (!%p240_p2)   ;;  %v2287_v6 = vld [vmem:[%s3242_s1 + $0x2c] ss:$16 sps:$4 sm:$0xff] (!%p240_p2)   ;;  %v2289_v7 = vld [vmem:[%s3242_s1 + $0x20] ss:$16 sps:$4 sm:$0xff] (!%p240_p2)  }
   0x9   : > { %469 = vmatpush1.bf16.msra.mxu0 (!%p240_p2), %v2283_v3  ;;  %874 = vmatpush1.bf16.msra.mxu1 (!%p240_p2), %v2284_v4  ;;  %v2290_v8 = vld [vmem:[%s3242_s1 + $0x28] ss:$16 sps:$4 sm:$0xff] (!%p240_p2)   ;;  %v2291_v9 = vld [vmem:[%s3242_s1 + $0x44] ss:$16 sps:$4 sm:$0xff] (!%p240_p2)   ;;  %v2293_v10 = vld [vmem:[%s3242_s1 + $0x4c] ss:$16 sps:$4 sm:$0xff] (!%p240_p2)  }
   0xa   : > { %470 = vmatprep.subr.bf16.mxu0 (!%p240_p2), %v2285_v5  ;;  %875 = vmatprep.subr.bf16.mxu1 (!%p240_p2), %v2287_v6  ;;  %v2295_v11 = vld [vmem:[%s3242_s1 + $0x40] ss:$16 sps:$4 sm:$0xff] (!%p240_p2)   ;;  %v2296_v12 = vld [vmem:[%s3242_s1 + $0x48] ss:$16 sps:$4 sm:$0xff] (!%p240_p2)   ;;  %v2297_v13 = vld [vmem:[%s3242_s1 + $0x64] ss:$16 sps:$4 sm:$0xff] (!%p240_p2)  }
   0xb   : > { %v2299_v14 = vld [vmem:[%s3242_s1 + $0x6c] ss:$16 sps:$4 sm:$0xff] (!%p240_p2)   ;;  %p272_p3 = scmp.lt.s32.totalorder (!%p240_p2), %s271_s20, 37  ;;  %v2301_v15 = vld [vmem:[%s3242_s1 + $0x60] ss:$16 sps:$4 sm:$0xff] (!%p240_p2)   ;;  %p277_p4 = scmp.lt.s32.totalorder (!%p240_p2), %s2499_s27, 1 }
   0xc   : > { %v2302_v16 = vld [vmem:[%s3242_s1 + $0x68] ss:$16 sps:$4 sm:$0xff] (!%p240_p2)   ;;  %v2303_v17 = vld [vmem:[%s3242_s1 + $0x84] ss:$16 sps:$4 sm:$0xff] (!%p240_p2)   ;;  %v2305_v18 = vld [vmem:[%s3242_s1 + $0x8c] ss:$16 sps:$4 sm:$0xff] (!%p240_p2)  }
   0xd   : > { %471 = vmatpush1.bf16.msra.mxu0 (!%p240_p2), %v2289_v7  ;;  %876 = vmatpush1.bf16.msra.mxu1 (!%p240_p2), %v2290_v8  ;;  %v2307_v19 = vld [vmem:[%s3242_s1 + $0x80] ss:$16 sps:$4 sm:$0xff] (!%p240_p2)   ;;  %v2308_v20 = vld [vmem:[%s3242_s1 + $0x88] ss:$16 sps:$4 sm:$0xff] (!%p240_p2)   ;;  %v2309_v21 = vld [vmem:[%s3242_s1 + $0xa4] ss:$16 sps:$4 sm:$0xff] (!%p240_p2)  }
   0xe   : > { %472 = vmatprep.subr.bf16.mxu0 %v2291_v9  ;;  %877 = vmatprep.subr.bf16.mxu1 %v2293_v10  ;;  %s3250_s20 = smov (!%p272_p3, %s271_s20), 37  ;;  %v2311_v22 = vld [vmem:[%s3242_s1 + $0xac] ss:$16 sps:$4 sm:$0xff]   ;;  %v2313_v23 = vld [vmem:[%s3242_s1 + $0xa0] ss:$16 sps:$4 sm:$0xff]   ;;  %s3252_s27 = smov (!%p277_p4, %s2499_s27), 1 }
   0xf   : > { %s2084_s6 = sshll.u32 %s3250_s20, 2  ;;  %v2314_v24 = vld [vmem:[%s3242_s1 + $0xa8] ss:$16 sps:$4 sm:$0xff]   ;;  %v2315_v25 = vld [vmem:[%s3242_s1 + $0xc4] ss:$16 sps:$4 sm:$0xff]   ;;  %s2197_s17 = sshll.u32 %s3252_s27, 4 }
  0x10   : > { %s2584_s15 = scalar_lea.vmem %s3241_s0, %s2084_s6  ;;  %v2317_v26 = vld [vmem:[%s3242_s1 + $0xcc] ss:$16 sps:$4 sm:$0xff]   ;;  %v2319_v27 = vld [vmem:[%s3242_s1 + $0xc0] ss:$16 sps:$4 sm:$0xff]   ;;  %v2320_v28 = vld [vmem:[%s3242_s1 + $0xc8] ss:$16 sps:$4 sm:$0xff]   ;;  %s281_s21 = scalar_lea.vmem %s3248_s7, %s2197_s17 }
  0x11   : > { %473 = vmatpush1.bf16.msra.mxu0 %v2295_v11  ;;  %878 = vmatpush1.bf16.msra.mxu1 %v2296_v12  ;;  %v2321_v29 = vld [vmem:[%s3242_s1 + $0xe4] ss:$16 sps:$4 sm:$0xff]   ;;  %v2323_v30 = vld [vmem:[%s3242_s1 + $0xec] ss:$16 sps:$4 sm:$0xff]   ;;  %v2325_v31 = vld [vmem:[%s3242_s1 + $0xe0] ss:$16 sps:$4 sm:$0xff]  }
  0x12   : > { %474 = vmatprep.subr.bf16.mxu0 %v2297_v13  ;;  %879 = vmatprep.subr.bf16.mxu1 %v2299_v14  ;;  %v2326_v32 = vld [vmem:[%s3242_s1 + $0xe8] ss:$16 sps:$4 sm:$0xff]   ;;  %v2327_v33 = vld [vmem:[%s2584_s15] sm:$0xff]   ;;  %v2345_v38 = vld [vmem:[%s3244_s3 + $0x114] ss:$8 sps:$4 sm:$0xff]  }
  0x13   : > { %v2339_v34 = vld [vmem:[%s3244_s3 + $0x104] ss:$8 sps:$4 sm:$0xff]   ;;  %v2337_v35 = vld [vmem:[%s3244_s3 + $0x100] ss:$8 sps:$4 sm:$0xff]   ;;  %v2348_v39 = vld [vmem:[%s3244_s3 + $0x14] ss:$8 sps:$4 sm:$0xff]  }
  0x14   : > { %v2342_v36 = vld [vmem:[%s3244_s3 + $0x4] ss:$8 sps:$4 sm:$0xff]   ;;  %v2340_v37 = vld [vmem:[%s3244_s3] ss:$8 sps:$4 sm:$0xff]   ;;  %v2343_v40 = vld [vmem:[%s3244_s3 + $0x110] ss:$8 sps:$4 sm:$0xff]  }
  0x15   : > { %475 = vmatpush1.bf16.msra.mxu0 %v2301_v15  ;;  %880 = vmatpush1.bf16.msra.mxu1 %v2302_v16  ;;  %v2346_v41 = vld [vmem:[%s3244_s3 + $0x10] ss:$8 sps:$4 sm:$0xff]   ;;  %v2351_v42 = vld [vmem:[%s3244_s3 + $0x124] ss:$8 sps:$4 sm:$0xff]   ;;  %v2349_v44 = vld [vmem:[%s3244_s3 + $0x120] ss:$8 sps:$4 sm:$0xff]  }
  0x16   : > { %476 = vmatprep.subr.bf16.mxu0 %v2303_v17  ;;  %881 = vmatprep.subr.bf16.mxu1 %v2305_v18  ;;  %v2328_v43 = vld [vmem:[%s2584_s15 + $0x8] sm:$0xff]   ;;  %v2357_v47 = vld [vmem:[%s3244_s3 + $0x134] ss:$8 sps:$4 sm:$0xff]   ;;  %v2355_v49 = vld [vmem:[%s3244_s3 + $0x130] ss:$8 sps:$4 sm:$0xff]  }
  0x17   : > { %v2354_v45 = vld [vmem:[%s3244_s3 + $0x24] ss:$8 sps:$4 sm:$0xff]   ;;  %v2352_v46 = vld [vmem:[%s3244_s3 + $0x20] ss:$8 sps:$4 sm:$0xff]   ;;  %v2360_v48 = vld [vmem:[%s3244_s3 + $0x34] ss:$8 sps:$4 sm:$0xff]  }
  0x18   : > { %v2358_v50 = vld [vmem:[%s3244_s3 + $0x30] ss:$8 sps:$4 sm:$0xff]   ;;  %v2363_v51 = vld [vmem:[%s3244_s3 + $0x144] ss:$8 sps:$4 sm:$0xff]   ;;  %v2361_v53 = vld [vmem:[%s3244_s3 + $0x140] ss:$8 sps:$4 sm:$0xff]  }
  0x19   : > { %477 = vmatpush1.bf16.msra.mxu0 %v2307_v19  ;;  %882 = vmatpush1.bf16.msra.mxu1 %v2308_v20  ;;  %v2329_v52 = vld [vmem:[%s2584_s15 + $0x10] sm:$0xff]   ;;  %v2366_v54 = vld [vmem:[%s3244_s3 + $0x44] ss:$8 sps:$4 sm:$0xff]   ;;  %v2364_v55 = vld [vmem:[%s3244_s3 + $0x40] ss:$8 sps:$4 sm:$0xff]  }
  0x1a   : > { %478 = vmatprep.subr.bf16.mxu0 %v2309_v21  ;;  %883 = vmatprep.subr.bf16.mxu1 %v2311_v22  ;;  %v2369_v56 = vld [vmem:[%s3244_s3 + $0x154] ss:$8 sps:$4 sm:$0xff]   ;;  %v2367_v58 = vld [vmem:[%s3244_s3 + $0x150] ss:$8 sps:$4 sm:$0xff]   ;;  %v2375_v60 = vld [vmem:[%s3244_s3 + $0x164] ss:$8 sps:$4 sm:$0xff]  }
  0x1b   : > { %v2372_v57 = vld [vmem:[%s3244_s3 + $0x54] ss:$8 sps:$4 sm:$0xff]   ;;  %v2370_v59 = vld [vmem:[%s3244_s3 + $0x50] ss:$8 sps:$4 sm:$0xff]   ;;  %v2373_v62 = vld [vmem:[%s3244_s3 + $0x160] ss:$8 sps:$4 sm:$0xff]  }
  0x1c   : > { %v2330_v61 = vld [vmem:[%s2584_s15 + $0x18] sm:$0xff]   ;;  %v2378_v63 = vld [vmem:[%s3244_s3 + $0x64] ss:$8 sps:$4 sm:$0xff]   ;;  %v2376_v0 = vld [vmem:[%s3244_s3 + $0x60] ss:$8 sps:$4 sm:$0xff]  }
  0x1d   : > { %479 = vmatpush1.bf16.msra.mxu0 %v2313_v23  ;;  %884 = vmatpush1.bf16.msra.mxu1 %v2314_v24  ;;  %v2381_v1 = vld [vmem:[%s3244_s3 + $0x174] ss:$8 sps:$4 sm:$0xff]   ;;  %v2331_v4 = vld [vmem:[%s2584_s15 + $0x20] sm:$0xff]   ;;  %v2379_v5 = vld [vmem:[%s3244_s3 + $0x170] ss:$8 sps:$4 sm:$0xff]  }
  0x1e   : > { %480 = vmatprep.subr.bf16.mxu0 %v2315_v25  ;;  %885 = vmatprep.subr.bf16.mxu1 %v2317_v26  ;;  %v2384_v3 = vld [vmem:[%s3244_s3 + $0x74] ss:$8 sps:$4 sm:$0xff]   ;;  %v2382_v6 = vld [vmem:[%s3244_s3 + $0x70] ss:$8 sps:$4 sm:$0xff]   ;;  %v2387_v7 = vld [vmem:[%s3244_s3 + $0x184] ss:$8 sps:$4 sm:$0xff]  }
  0x1f   : > { %v2385_v8 = vld [vmem:[%s3244_s3 + $0x180] ss:$8 sps:$4 sm:$0xff]   ;;  %v2390_v10 = vld [vmem:[%s3244_s3 + $0x84] ss:$8 sps:$4 sm:$0xff]   ;;  %v2393_v11 = vld [vmem:[%s3244_s3 + $0x194] ss:$8 sps:$4 sm:$0xff]  }
  0x20   : > { %v2388_v9 = vld [vmem:[%s3244_s3 + $0x80] ss:$8 sps:$4 sm:$0xff]   ;;  %v2396_v12 = vld [vmem:[%s3244_s3 + $0x94] ss:$8 sps:$4 sm:$0xff]   ;;  %v2391_v13 = vld [vmem:[%s3244_s3 + $0x190] ss:$8 sps:$4 sm:$0xff]  }
  0x21   : > { %481 = vmatpush1.bf16.msra.mxu0 %v2319_v27  ;;  %886 = vmatpush1.bf16.msra.mxu1 %v2320_v28  ;;  %v2394_v14 = vld [vmem:[%s3244_s3 + $0x90] ss:$8 sps:$4 sm:$0xff]   ;;  %v2399_v15 = vld [vmem:[%s3244_s3 + $0x1a4] ss:$8 sps:$4 sm:$0xff]   ;;  %v2397_v17 = vld [vmem:[%s3244_s3 + $0x1a0] ss:$8 sps:$4 sm:$0xff]  }
  0x22   : > { %482 = vmatprep.subr.bf16.mxu0 %v2321_v29  ;;  %887 = vmatprep.subr.bf16.mxu1 %v2323_v30  ;;  %v2332_v16 = vld [vmem:[%s2584_s15 + $0x28] sm:$0xff]   ;;  %v2405_v20 = vld [vmem:[%s3244_s3 + $0x1b4] ss:$8 sps:$4 sm:$0xff]   ;;  %v2403_v22 = vld [vmem:[%s3244_s3 + $0x1b0] ss:$8 sps:$4 sm:$0xff]  }
  0x23   : > { %v2402_v18 = vld [vmem:[%s3244_s3 + $0xa4] ss:$8 sps:$4 sm:$0xff]   ;;  %v2400_v19 = vld [vmem:[%s3244_s3 + $0xa0] ss:$8 sps:$4 sm:$0xff]   ;;  %v2408_v21 = vld [vmem:[%s3244_s3 + $0xb4] ss:$8 sps:$4 sm:$0xff]  }
  0x24   : > { %v2406_v23 = vld [vmem:[%s3244_s3 + $0xb0] ss:$8 sps:$4 sm:$0xff]   ;;  %v2411_v24 = vld [vmem:[%s3244_s3 + $0x1c4] ss:$8 sps:$4 sm:$0xff]   ;;  %v2409_v26 = vld [vmem:[%s3244_s3 + $0x1c0] ss:$8 sps:$4 sm:$0xff]  }
  0x25   : > { %483 = vmatpush1.bf16.msra.mxu0 %v2325_v31  ;;  %888 = vmatpush1.bf16.msra.mxu1 %v2326_v32  ;;  %v2333_v25 = vld [vmem:[%s2584_s15 + $0x30] sm:$0xff]   ;;  %v2414_v27 = vld [vmem:[%s3244_s3 + $0xc4] ss:$8 sps:$4 sm:$0xff]   ;;  %v2412_v28 = vld [vmem:[%s3244_s3 + $0xc0] ss:$8 sps:$4 sm:$0xff]  }
  0x26   : > { %1330 = vmatprep.subr.bf16.mxu1 %v2339_v34  ;;  %1621 = vmatprep.subr.bf16.mxu0 %v2342_v36  ;;  %v2334_v29 = vld [vmem:[%s2584_s15 + $0x38] sm:$0xff]   ;;  %v2335_v30 = vld [vmem:[%s2584_s15 + $0x40] sm:$0xff]   ;;  %v2336_v31 = vld [vmem:[%s2584_s15 + $0x48] ss:$0 sps:$4 sm:$0xff]  }
  0x27   : > { %v2417_v32 = vld [vmem:[%s3244_s3 + $0x1d4] ss:$8 sps:$4 sm:$0xff]   ;;  %v2415_v34 = vld [vmem:[%s3244_s3 + $0x1d0] ss:$8 sps:$4 sm:$0xff]   ;;  %v2426_v36 = vld [vmem:[%s3244_s3 + $0xe4] ss:$8 sps:$4 sm:$0xff]  }
  0x28   : > { %501 = vmatmul.mubr.bf16.vlgmr.msra.gmra.mrb[0].mxu0 %v2327_v33  ;;  %906 = vmatmul.mubr.bf16.vlgmr.msra.gmra.mrb[0].mxu1 %v2327_v33  ;;  %v2420_v33 = vld [vmem:[%s3244_s3 + $0xd4] ss:$8 sps:$4 sm:$0xff]  }
  0x29   : > { %510 = vmatprep.mubr.bf16.mxu0 %v2449_v2  ;;  %915 = vmatprep.mubr.bf16.mxu1 %v2449_v2 }
  0x2a   : > { %1331 = vmatpush1.bf16.msra.mxu1 %v2337_v35  ;;  %1622 = vmatpush1.bf16.msra.mxu0 %v2340_v37  ;;  %v2418_v35 = vld [vmem:[%s3244_s3 + $0xd0] ss:$8 sps:$4 sm:$0xff]   ;;  %v2421_v37 = vld [vmem:[%s3244_s3 + $0x1e0] ss:$8 sps:$4 sm:$0xff]  }
  0x2b   : > { %1332 = vmatprep.subr.bf16.mxu1 %v2345_v38  ;;  %1623 = vmatprep.subr.bf16.mxu0 %v2348_v39  ;;  %v2424_v38 = vld [vmem:[%s3244_s3 + $0xe0] ss:$8 sps:$4 sm:$0xff]   ;;  %v2429_v39 = vld [vmem:[%s3244_s3 + $0x1f4] ss:$8 sps:$4 sm:$0xff]  }
  0x2e   : > { %1333 = vmatpush1.bf16.msra.mxu1 %v2343_v40  ;;  %1624 = vmatpush1.bf16.msra.mxu0 %v2346_v41  ;;  %v2432_v40 = vld [vmem:[%s3244_s3 + $0xf4] ss:$8 sps:$4 sm:$0xff]   ;;  %v2427_v41 = vld [vmem:[%s3244_s3 + $0x1f0] ss:$8 sps:$4 sm:$0xff]  }
  0x2f   : > { %1334 = vmatprep.subr.bf16.mxu1 %v2351_v42  ;;  %1625 = vmatprep.subr.bf16.mxu0 %v2354_v45  ;;  %v2430_v42 = vld [vmem:[%s3244_s3 + $0xf0] ss:$8 sps:$4 sm:$0xff]  }
  0x30   : > { %511 = vmatmul.mubr.bf16.gmra.mrb[4].mxu0 %v2328_v43  ;;  %916 = vmatmul.mubr.bf16.gmra.mrb[4].mxu1 %v2328_v43  ;;  %v320_v43 = vlaneseq }
  0x31   : > { %520 = vmatprep.mubr.bf16.mxu0 %v2449_v2  ;;  %925 = vmatprep.mubr.bf16.mxu1 %v2449_v2 }
  0x32   : > { %1335 = vmatpush1.bf16.msra.mxu1 %v2349_v44  ;;  %1626 = vmatpush1.bf16.msra.mxu0 %v2352_v46  ;;  %v321_v44 = vshrl.u32 %v320_v43, 7  ;;  %v318_v46 = vld [vmem:[%s3243_s2] sm:$0x3] }
  0x33   : > { %1336 = vmatprep.subr.bf16.mxu1 %v2357_v47  ;;  %1627 = vmatprep.subr.bf16.mxu0 %v2360_v48  ;;  %v781_v47 = vld [vmem:[%s3243_s2 + $0x2] sm:$0x3] }
  0x34   : > { %v2827_v45 = vsub.s32 0, %v321_v44  ;;  %v2835_v48 = vsub.s32 1, %v321_v44 }
  0x36   : > { %1337 = vmatpush1.bf16.msra.mxu1 %v2355_v49  ;;  %1628 = vmatpush1.bf16.msra.mxu0 %v2358_v50  ;;  %v2838_v49 = vrot.slane %v318_v46, %v2827_v45  ;;  %v2841_v50 = vrot.slane %v781_v47, %v2827_v45 }
  0x37   : > { %1338 = vmatprep.subr.bf16.mxu1 %v2363_v51  ;;  %1629 = vmatprep.subr.bf16.mxu0 %v2366_v54  ;;  %v2844_v51 = vrot.slane %v318_v46, %v2835_v48 }
  0x38   : > { %521 = vmatmul.mubr.bf16.gmra.mrb[8].mxu0 %v2329_v52  ;;  %926 = vmatmul.mubr.bf16.gmra.mrb[8].mxu1 %v2329_v52  ;;  %v2847_v52 = vrot.slane %v781_v47, %v2835_v48 }
  0x39   : > { %530 = vmatprep.mubr.bf16.mxu0 %v2449_v2  ;;  %935 = vmatprep.mubr.bf16.mxu1 %v2449_v2 }
  0x3a   : > { %1339 = vmatpush1.bf16.msra.mxu1 %v2361_v53  ;;  %1630 = vmatpush1.bf16.msra.mxu0 %v2364_v55 }
  0x3b   : > { %1340 = vmatprep.subr.bf16.mxu1 %v2369_v56  ;;  %1631 = vmatprep.subr.bf16.mxu0 %v2372_v57 }
  0x3e   : > { %1341 = vmatpush1.bf16.msra.mxu1 %v2367_v58  ;;  %1632 = vmatpush1.bf16.msra.mxu0 %v2370_v59 }
  0x3f   : > { %1342 = vmatprep.subr.bf16.mxu1 %v2375_v60  ;;  %1633 = vmatprep.subr.bf16.mxu0 %v2378_v63 }
  0x40   : > { %531 = vmatmul.mubr.bf16.gmra.mrb[12].mxu0 %v2330_v61  ;;  %936 = vmatmul.mubr.bf16.gmra.mrb[12].mxu1 %v2330_v61 }
  0x41   : > { %540 = vmatprep.mubr.bf16.mxu0 %v2449_v2  ;;  %945 = vmatprep.mubr.bf16.mxu1 %v2449_v2 }
  0x42   : > { %1343 = vmatpush1.bf16.msra.mxu1 %v2373_v62  ;;  %1634 = vmatpush1.bf16.msra.mxu0 %v2376_v0 }
  0x43   : > { %1344 = vmatprep.subr.bf16.mxu1 %v2381_v1  ;;  %1635 = vmatprep.subr.bf16.mxu0 %v2384_v3 }
  0x46   : > { %1345 = vmatpush1.bf16.msra.mxu1 %v2379_v5  ;;  %1636 = vmatpush1.bf16.msra.mxu0 %v2382_v6 }
  0x47   : > { %1346 = vmatprep.subr.bf16.mxu1 %v2387_v7  ;;  %1637 = vmatprep.subr.bf16.mxu0 %v2390_v10 }
  0x48   : > { %541 = vmatmul.mubr.bf16.gmra.mrb[16].mxu0 %v2331_v4  ;;  %946 = vmatmul.mubr.bf16.gmra.mrb[16].mxu1 %v2331_v4 }
  0x49   : > { %550 = vmatprep.mubr.bf16.mxu0 %v2449_v2  ;;  %955 = vmatprep.mubr.bf16.mxu1 %v2449_v2 }
  0x4a   : > { %1347 = vmatpush1.bf16.msra.mxu1 %v2385_v8  ;;  %1638 = vmatpush1.bf16.msra.mxu0 %v2388_v9 }
  0x4b   : > { %1348 = vmatprep.subr.bf16.mxu1 %v2393_v11  ;;  %1639 = vmatprep.subr.bf16.mxu0 %v2396_v12 }
  0x4e   : > { %1349 = vmatpush1.bf16.msra.mxu1 %v2391_v13  ;;  %1640 = vmatpush1.bf16.msra.mxu0 %v2394_v14 }
  0x4f   : > { %1350 = vmatprep.subr.bf16.mxu1 %v2399_v15  ;;  %1641 = vmatprep.subr.bf16.mxu0 %v2402_v18 }
  0x50   : > { %551 = vmatmul.mubr.bf16.gmra.mrb[20].mxu0 %v2332_v16  ;;  %956 = vmatmul.mubr.bf16.gmra.mrb[20].mxu1 %v2332_v16 }
  0x51   : > { %560 = vmatprep.mubr.bf16.mxu0 %v2449_v2  ;;  %965 = vmatprep.mubr.bf16.mxu1 %v2449_v2 }
  0x52   : > { %1351 = vmatpush1.bf16.msra.mxu1 %v2397_v17  ;;  %1642 = vmatpush1.bf16.msra.mxu0 %v2400_v19 }
  0x53   : > { %1352 = vmatprep.subr.bf16.mxu1 %v2405_v20  ;;  %1643 = vmatprep.subr.bf16.mxu0 %v2408_v21 }
  0x56   : > { %1353 = vmatpush1.bf16.msra.mxu1 %v2403_v22  ;;  %1644 = vmatpush1.bf16.msra.mxu0 %v2406_v23 }
  0x57   : > { %1354 = vmatprep.subr.bf16.mxu1 %v2411_v24  ;;  %1645 = vmatprep.subr.bf16.mxu0 %v2414_v27 }
  0x58   : > { %561 = vmatmul.mubr.bf16.gmra.mrb[24].mxu0 %v2333_v25  ;;  %966 = vmatmul.mubr.bf16.gmra.mrb[24].mxu1 %v2333_v25 }
  0x59   : > { %570 = vmatprep.mubr.bf16.mxu0 %v2449_v2  ;;  %975 = vmatprep.mubr.bf16.mxu1 %v2449_v2 }
  0x5a   : > { %1355 = vmatpush1.bf16.msra.mxu1 %v2409_v26  ;;  %1646 = vmatpush1.bf16.msra.mxu0 %v2412_v28 }
  0x5b   : > { %1356 = vmatprep.subr.bf16.mxu1 %v2417_v32  ;;  %1647 = vmatprep.subr.bf16.mxu0 %v2420_v33 }
  0x5e   : > { %1357 = vmatpush1.bf16.msra.mxu1 %v2415_v34  ;;  %1648 = vmatpush1.bf16.msra.mxu0 %v2418_v35 }
  0x5f   : > { %1649 = vmatprep.subr.bf16.mxu0 %v2426_v36 }
  0x60   : > { %571 = vmatmul.mubr.bf16.gmra.mrb[28].mxu0 %v2334_v29  ;;  %976 = vmatmul.mubr.bf16.gmra.mrb[28].mxu1 %v2334_v29 }
  0x61   : > { %580 = vmatprep.mubr.bf16.mxu0 %v2449_v2  ;;  %985 = vmatprep.mubr.bf16.mxu1 %v2449_v2 }
  0x62   : > { %1650 = vmatpush1.bf16.msra.mxu0 %v2424_v38 }
  0x63   : > { %1651 = vmatprep.subr.bf16.mxu0 %v2432_v40 }
  0x66   : > { %1652 = vmatpush1.bf16.msra.mxu0 %v2430_v42 }
  0x68   : > { %581 = vmatmul.mubr.bf16.gmra.mrb[32].mxu0 %v2335_v30  ;;  %986 = vmatmul.mubr.bf16.gmra.mrb[32].mxu1 %v2335_v30 }
  0x69   : > { %590 = vmatprep.mubr.bf16.mxu0 %v2449_v2  ;;  %995 = vmatprep.mubr.bf16.mxu1 %v2449_v2  ;;  %v2423_v2 = vld [vmem:[%s3244_s3 + $0x1e4] ss:$8 sps:$4 sm:$0xff]  }
  0x6a   : > { %1358 = vmatprep.subr.bf16.mxu1 %v2423_v2 }
  0x6b   : > { %1359 = vmatpush1.bf16.msra.mxu1 %v2421_v37 }
  0x6c   : > { %1360 = vmatprep.subr.bf16.mxu1 %v2429_v39 }
  0x6f   : > { %1361 = vmatpush1.bf16.msra.mxu1 %v2427_v41 }
  0x70   : > { %591 = vmatmul.mubr.bf16.gmra.mrb[36].mxu0 %v2336_v31  ;;  %996 = vmatmul.mubr.bf16.gmra.mrb[36].mxu1 %v2336_v31 }
  0xfb   : > { %v502_v53 = vpop.f32.mrb[0].mxu0  ;;  %v907_v54 = vpop.f32.mrb[0].mxu1 }
  0xfc   : > { %v503_v55 = vadd.f32 %v502_v53, %v2838_v49  ;;  %v908_v56 = vadd.f32 %v907_v54, %v2841_v50  ;;  %v504_v57 = vpop.f32.mrb[1].mxu0  ;;  %v909_v58 = vpop.f32.mrb[1].mxu1 }
  0xfd   : > { %v505_v59 = vadd.f32 %v504_v57, %v2844_v51  ;;  %v910_v60 = vadd.f32 %v909_v58, %v2847_v52  ;;  %v506_v61 = vpop.f32.mrb[2].mxu0  ;;  %v911_v62 = vpop.f32.mrb[2].mxu1 }
  0xfe   : > { %vm599_vm0 = vcmp.gt.f32.partialorder %v503_v55, 0.0  ;;  %v637_v63 = vmul.f32 0.2, %v503_v55  ;;  %vm1004_vm1 = vcmp.gt.f32.partialorder %v908_v56, 0.0  ;;  %v1042_v0 = vmul.f32 0.2, %v908_v56 }
  0xff   : > { %vm600_vm2 = vcmp.gt.f32.partialorder %v505_v59, 0.0  ;;  %v638_v1 = vmul.f32 0.2, %v505_v59  ;;  %v507_v3 = vadd.f32 %v506_v61, %v2838_v49  ;;  %v912_v4 = vadd.f32 %v911_v62, %v2841_v50  ;;  %v508_v5 = vpop.f32.mrb[3].mxu0  ;;  %v913_v6 = vpop.f32.mrb[3].mxu1 }
 0x100   : > { %vm1005_vm3 = vcmp.gt.f32.partialorder %v910_v60, 0.0  ;;  %v1043_v7 = vmul.f32 0.2, %v910_v60  ;;  %v509_v8 = vadd.f32 %v508_v5, %v2844_v51  ;;  %v914_v9 = vadd.f32 %v913_v6, %v2847_v52 }
 0x101   : > { %vm601_vm4 = vcmp.gt.f32.partialorder %v507_v3, 0.0  ;;  %v639_v10 = vmul.f32 0.2, %v507_v3  ;;  %vm1006_vm5 = vcmp.gt.f32.partialorder %v912_v4, 0.0  ;;  %v1044_v11 = vmul.f32 0.2, %v912_v4 }
 0x102   : > { %vm602_vm6 = vcmp.gt.f32.partialorder %v509_v8, 0.0  ;;  %v640_v12 = vmul.f32 0.2, %v509_v8  ;;  %vm1007_vm7 = vcmp.gt.f32.partialorder %v914_v9, 0.0  ;;  %v1045_v13 = vmul.f32 0.2, %v914_v9 }
 0x103   : > { %v675_v14 = vsel %vm599_vm0, %v503_v55, %v637_v63  ;;  %v1080_v15 = vsel %vm1004_vm1, %v908_v56, %v1042_v0  ;;  %v677_v16 = vsel %vm601_vm4, %v507_v3, %v639_v10  ;;  %v1082_v17 = vsel %vm1006_vm5, %v912_v4, %v1044_v11  ;;  %v512_v18 = vpop.f32.mrb[4].mxu0  ;;  %v917_v19 = vpop.f32.mrb[4].mxu1 }
 0x104   : > { %v713_v20 = vpack.c.bf16 %v677_v16, %v675_v14  ;;  %v1118_v21 = vpack.c.bf16 %v1082_v17, %v1080_v15  ;;  %v513_v22 = vadd.f32 %v512_v18, %v2838_v49  ;;  %v514_v23 = vpop.f32.mrb[5].mxu0  ;;  %v919_v24 = vpop.f32.mrb[5].mxu1  ;;  %v1083_v29 = vsel %vm1007_vm7, %v914_v9, %v1045_v13 }
 0x105   : > { %v515_v25 = vadd.f32 %v514_v23, %v2844_v51  ;;  %v920_v26 = vadd.f32 %v919_v24, %v2847_v52  ;;  %v516_v27 = vpop.f32.mrb[6].mxu0  ;;  %v921_v28 = vpop.f32.mrb[6].mxu1  ;;  %v678_v30 = vsel %vm602_vm6, %v509_v8, %v640_v12  ;;  %v1081_v31 = vsel %vm1005_vm3, %v910_v60, %v1043_v7 }
 0x106   : > { %vm603_vm8 = vcmp.gt.f32.partialorder %v513_v22, 0.0  ;;  %v676_v32 = vsel %vm600_vm2, %v505_v59, %v638_v1  ;;  %v641_v33 = vmul.f32 0.2, %v513_v22  ;;  %v918_v34 = vadd.f32 %v917_v19, %v2841_v50  ;;  %v518_v38 = vpop.f32.mrb[7].mxu0  ;;  %v923_v39 = vpop.f32.mrb[7].mxu1 }
 0x107   : > { %v642_v35 = vmul.f32 0.2, %v515_v25  ;;  %v1047_v2 = vmul.f32 0.2, %v920_v26  ;;  %v517_v36 = vadd.f32 %v516_v27, %v2838_v49  ;;  %v922_v37 = vadd.f32 %v921_v28, %v2841_v50 }
 0x108   : > { %v1119_v40 = vpack.c.bf16 %v1083_v29, %v1081_v31  ;;  %v714_v41 = vpack.c.bf16 %v678_v30, %v676_v32  ;;  %vm604_vm9 = vcmp.gt.f32.partialorder %v515_v25, 0.0  ;;  %vm1009_vm10 = vcmp.gt.f32.partialorder %v920_v26, 0.0 }
 0x109   : > { %v519_v42 = vadd.f32 %v518_v38, %v2844_v51  ;;  %v924_v43 = vadd.f32 %v923_v39, %v2847_v52  ;;  %vm605_vm11 = vcmp.gt.f32.partialorder %v517_v36, 0.0  ;;  %v643_v44 = vmul.f32 0.2, %v517_v36 }
 0x10a   : > { %vm1010_vm12 = vcmp.gt.f32.partialorder %v922_v37, 0.0  ;;  %v1048_v46 = vmul.f32 0.2, %v922_v37  ;;  %1362 = vmatprep.mubr.bf16.mxu1 %v1119_v40  ;;  %1653 = vmatprep.mubr.bf16.mxu0 %v714_v41  ;;  %vm1008_vm15 = vcmp.gt.f32.partialorder %v918_v34, 0.0  ;;  %v1046_v54 = vmul.f32 0.2, %v918_v34 }
 0x10b   : > { %vm606_vm13 = vcmp.gt.f32.partialorder %v519_v42, 0.0  ;;  %v644_v47 = vmul.f32 0.2, %v519_v42  ;;  %vm1011_vm14 = vcmp.gt.f32.partialorder %v924_v43, 0.0  ;;  %v1049_v53 = vmul.f32 0.2, %v924_v43  ;;  %1363 = vmatmul.mubr.bf16.vlgmr.msra.gmra.mrb[40].mxu1 %v1118_v21  ;;  %1654 = vmatmul.mubr.bf16.vlgmr.msra.gmra.mrb[40].mxu0 %v713_v20 }
 0x10c   : > { %v522_v55 = vpop.f32.mrb[8].mxu0  ;;  %v927_v56 = vpop.f32.mrb[8].mxu1  ;;  %v1085_v57 = vsel %vm1009_vm10, %v920_v26, %v1047_v2  ;;  %v680_v58 = vsel %vm604_vm9, %v515_v25, %v642_v35  ;;  %v1086_v63 = vsel %vm1010_vm12, %v922_v37, %v1048_v46  ;;  %v681_v0 = vsel %vm605_vm11, %v517_v36, %v643_v44 }
 0x10d   : > { %v524_v59 = vpop.f32.mrb[9].mxu0  ;;  %v929_v60 = vpop.f32.mrb[9].mxu1  ;;  %v1087_v61 = vsel %vm1011_vm14, %v924_v43, %v1049_v53  ;;  %v682_v62 = vsel %vm606_vm13, %v519_v42, %v644_v47  ;;  %v2876_v1 = vadd.f32 %v522_v55, %v2838_v49  ;;  %v1084_v9 = vsel %vm1008_vm15, %v918_v34, %v1046_v54 }
 0x10e   : > { %v525_v3 = vadd.f32 %v524_v59, %v2844_v51  ;;  %v526_v4 = vpop.f32.mrb[10].mxu0  ;;  %v931_v5 = vpop.f32.mrb[10].mxu1  ;;  %v1121_v6 = vpack.c.bf16 %v1087_v61, %v1085_v57  ;;  %v716_v7 = vpack.c.bf16 %v682_v62, %v680_v58  ;;  %v930_v8 = vadd.f32 %v929_v60, %v2847_v52 }
 0x10f   : > { %v679_v10 = vsel %vm603_vm8, %v513_v22, %v641_v33  ;;  %v928_v11 = vadd.f32 %v927_v56, %v2841_v50  ;;  %v932_v12 = vadd.f32 %v931_v5, %v2841_v50  ;;  %v528_v13 = vpop.f32.mrb[11].mxu0  ;;  %v933_v14 = vpop.f32.mrb[11].mxu1  ;;  %v1120_v15 = vpack.c.bf16 %v1086_v63, %v1084_v9 }
 0x110   : > { %1372 = vmatprep.mubr.bf16.mxu1 %v1121_v6  ;;  %1663 = vmatprep.mubr.bf16.mxu0 %v716_v7  ;;  %v715_v16 = vpack.c.bf16 %v681_v0, %v679_v10  ;;  %vm607_vm0 = vcmp.gt.f32.partialorder %v2876_v1, 0.0  ;;  %v646_v17 = vmul.f32 0.2, %v525_v3  ;;  %v529_v18 = vadd.f32 %v528_v13, %v2844_v51 }
 0x111   : > { %v934_v19 = vadd.f32 %v933_v14, %v2847_v52  ;;  %v1051_v23 = vmul.f32 0.2, %v930_v8  ;;  %v527_v22 = vadd.f32 %v526_v4, %v2838_v49  ;;  %vm1014_vm1 = vcmp.gt.f32.partialorder %v932_v12, 0.0 }
 0x112   : > { %v1052_v24 = vmul.f32 0.2, %v932_v12  ;;  %vm610_vm2 = vcmp.gt.f32.partialorder %v529_v18, 0.0  ;;  %v648_v25 = vmul.f32 0.2, %v529_v18  ;;  %vm608_vm4 = vcmp.gt.f32.partialorder %v525_v3, 0.0 }
 0x113   : > { %v532_v20 = vpop.f32.mrb[12].mxu0  ;;  %v937_v21 = vpop.f32.mrb[12].mxu1  ;;  %1373 = vmatmul.mubr.bf16.gmra.mrb[44].mxu1 %v1120_v15  ;;  %1664 = vmatmul.mubr.bf16.gmra.mrb[44].mxu0 %v715_v16  ;;  %vm1015_vm3 = vcmp.gt.f32.partialorder %v934_v19, 0.0  ;;  %v1053_v26 = vmul.f32 0.2, %v934_v19  ;;  %vm1013_vm5 = vcmp.gt.f32.partialorder %v930_v8, 0.0  ;;  %v684_v40 = vsel %vm608_vm4, %v525_v3, %v646_v17 }
 0x114   : > { %v1050_v27 = vmul.f32 0.2, %v928_v11  ;;  %v534_v28 = vpop.f32.mrb[13].mxu0  ;;  %v939_v29 = vpop.f32.mrb[13].mxu1  ;;  %vm1012_vm6 = vcmp.gt.f32.partialorder %v928_v11, 0.0  ;;  %v2889_v30 = vadd.f32 %v532_v20, %v2838_v49  ;;  %v686_v34 = vsel %vm610_vm2, %v529_v18, %v648_v25 }
 0x115   : > { %v536_v31 = vpop.f32.mrb[14].mxu0  ;;  %v941_v32 = vpop.f32.mrb[14].mxu1  ;;  %v1091_v33 = vsel %vm1015_vm3, %v934_v19, %v1053_v26  ;;  %v645_v35 = vmul.f32 0.2, %v2876_v1  ;;  %v2893_v2 = vadd.f32 %v937_v21, %v2841_v50  ;;  %v940_v36 = vadd.f32 %v939_v29, %v2847_v52 }
 0x116   : > { %v1090_v37 = vsel %vm1014_vm1, %v932_v12, %v1052_v24  ;;  %vm609_vm7 = vcmp.gt.f32.partialorder %v527_v22, 0.0  ;;  %v647_v38 = vmul.f32 0.2, %v527_v22  ;;  %v1089_v39 = vsel %vm1013_vm5, %v930_v8, %v1051_v23  ;;  %v538_v42 = vpop.f32.mrb[15].mxu0  ;;  %v943_v43 = vpop.f32.mrb[15].mxu1 }
 0x117   : > { %v2899_v41 = vadd.f32 %v534_v28, %v2844_v51  ;;  %v1123_v44 = vpack.c.bf16 %v1091_v33, %v1089_v39  ;;  %v718_v46 = vpack.c.bf16 %v686_v34, %v684_v40  ;;  %v1088_v47 = vsel %vm1012_vm6, %v928_v11, %v1050_v27 }
 0x118   : > { %v649_v53 = vmul.f32 0.2, %v2889_v30  ;;  %v539_v54 = vadd.f32 %v538_v42, %v2844_v51  ;;  %v944_v55 = vadd.f32 %v943_v43, %v2847_v52  ;;  %v1122_v56 = vpack.c.bf16 %v1090_v37, %v1088_v47 }
 0x119   : > { %vm611_vm8 = vcmp.gt.f32.partialorder %v2889_v30, 0.0  ;;  %vm1016_vm9 = vcmp.gt.f32.partialorder %v2893_v2, 0.0  ;;  %v1054_v59 = vmul.f32 0.2, %v2893_v2  ;;  %v1055_v60 = vmul.f32 0.2, %v940_v36  ;;  %1382 = vmatprep.mubr.bf16.mxu1 %v1123_v44  ;;  %1673 = vmatprep.mubr.bf16.mxu0 %v718_v46 }
 0x11a   : > { %v537_v61 = vadd.f32 %v536_v31, %v2838_v49  ;;  %v942_v62 = vadd.f32 %v941_v32, %v2841_v50  ;;  %vm1019_vm10 = vcmp.gt.f32.partialorder %v944_v55, 0.0  ;;  %v1057_v63 = vmul.f32 0.2, %v944_v55 }
 0x11b   : > { %v542_v57 = vpop.f32.mrb[16].mxu0  ;;  %v947_v58 = vpop.f32.mrb[16].mxu1  ;;  %1383 = vmatmul.mubr.bf16.gmra.mrb[48].mxu1 %v1122_v56  ;;  %vm1017_vm11 = vcmp.gt.f32.partialorder %v940_v36, 0.0  ;;  %v683_v0 = vsel %vm607_vm0, %v2876_v1, %v645_v35  ;;  %v685_v3 = vsel %vm609_vm7, %v527_v22, %v647_v38  ;;  %v652_v7 = vmul.f32 0.2, %v539_v54 }
 0x11c   : > { %v2915_v4 = vadd.f32 %v542_v57, %v2838_v49  ;;  %v544_v5 = vpop.f32.mrb[17].mxu0  ;;  %v949_v6 = vpop.f32.mrb[17].mxu1  ;;  %v717_v8 = vpack.c.bf16 %v685_v3, %v683_v0  ;;  %v2918_v9 = vadd.f32 %v947_v58, %v2841_v50  ;;  %v1095_v12 = vsel %vm1019_vm10, %v944_v55, %v1057_v63 }
 0x11d   : > { %v546_v10 = vpop.f32.mrb[18].mxu0  ;;  %v951_v11 = vpop.f32.mrb[18].mxu1  ;;  %vm612_vm12 = vcmp.gt.f32.partialorder %v2899_v41, 0.0  ;;  %v650_v13 = vmul.f32 0.2, %v2899_v41  ;;  %vm614_vm13 = vcmp.gt.f32.partialorder %v539_v54, 0.0  ;;  %v2923_v1 = vadd.f32 %v544_v5, %v2844_v51 }
 0x11e   : > { %vm613_vm14 = vcmp.gt.f32.partialorder %v537_v61, 0.0  ;;  %v651_v14 = vmul.f32 0.2, %v537_v61  ;;  %vm1018_vm15 = vcmp.gt.f32.partialorder %v942_v62, 0.0  ;;  %1674 = vmatmul.mubr.bf16.gmra.mrb[48].mxu0 %v717_v8  ;;  %v1093_v15 = vsel %vm1017_vm11, %v940_v36, %v1055_v60  ;;  %v548_v18 = vpop.f32.mrb[19].mxu0  ;;  %v953_v19 = vpop.f32.mrb[19].mxu1 }
 0x11f   : > { %v1056_v16 = vmul.f32 0.2, %v942_v62  ;;  %v2927_v17 = vmul.f32 0.2, %v2915_v4  ;;  %v1125_v20 = vpack.c.bf16 %v1095_v12, %v1093_v15  ;;  %vm1020_vm0 = vcmp.gt.f32.partialorder %v2918_v9, 0.0 }
 0x120   : > { %v2931_v21 = vmul.f32 0.2, %v2918_v9  ;;  %v950_v23 = vadd.f32 %v949_v6, %v2847_v52  ;;  %v690_v22 = vsel %vm614_vm13, %v539_v54, %v652_v7  ;;  %vm615_vm1 = vcmp.gt.f32.partialorder %v2915_v4, 0.0 }
 0x121   : > { %vm616_vm2 = vcmp.gt.f32.partialorder %v2923_v1, 0.0  ;;  %v654_v26 = vmul.f32 0.2, %v2923_v1  ;;  %v547_v27 = vadd.f32 %v546_v10, %v2838_v49  ;;  %v954_v28 = vadd.f32 %v953_v19, %v2847_v52  ;;  %1392 = vmatprep.mubr.bf16.mxu1 %v1125_v20 }
 0x122   : > { %v952_v29 = vadd.f32 %v951_v11, %v2841_v50  ;;  %v549_v31 = vadd.f32 %v548_v18, %v2844_v51  ;;  %v688_v32 = vsel %vm612_vm12, %v2899_v41, %v650_v13  ;;  %v1092_v33 = vsel %vm1016_vm9, %v2893_v2, %v1054_v59 }
 0x123   : > { %v552_v24 = vpop.f32.mrb[20].mxu0  ;;  %v957_v25 = vpop.f32.mrb[20].mxu1  ;;  %v720_v34 = vpack.c.bf16 %v690_v22, %v688_v32  ;;  %v1094_v35 = vsel %vm1018_vm15, %v942_v62, %v1056_v16  ;;  %v687_v36 = vsel %vm611_vm8, %v2889_v30, %v649_v53  ;;  %v689_v37 = vsel %vm613_vm14, %v537_v61, %v651_v14 }
 0x124   : > { %v554_v38 = vpop.f32.mrb[21].mxu0  ;;  %v959_v39 = vpop.f32.mrb[21].mxu1  ;;  %vm1021_vm3 = vcmp.gt.f32.partialorder %v950_v23, 0.0  ;;  %v1124_v40 = vpack.c.bf16 %v1094_v35, %v1092_v33  ;;  %v719_v42 = vpack.c.bf16 %v689_v37, %v687_v36  ;;  %v2953_v41 = vadd.f32 %v552_v24, %v2838_v49 }
 0x125   : > { %v556_v43 = vpop.f32.mrb[22].mxu0  ;;  %v961_v44 = vpop.f32.mrb[22].mxu1  ;;  %v1059_v2 = vmul.f32 0.2, %v950_v23  ;;  %v1061_v46 = vmul.f32 0.2, %v954_v28  ;;  %1683 = vmatprep.mubr.bf16.mxu0 %v720_v34  ;;  %v2956_v47 = vadd.f32 %v957_v25, %v2841_v50  ;;  %v2959_v55 = vadd.f32 %v554_v38, %v2844_v51 }
 0x126   : > { %v558_v54 = vpop.f32.mrb[23].mxu0  ;;  %v963_v30 = vpop.f32.mrb[23].mxu1  ;;  %vm617_vm4 = vcmp.gt.f32.partialorder %v547_v27, 0.0  ;;  %v656_v53 = vmul.f32 0.2, %v549_v31  ;;  %vm1023_vm5 = vcmp.gt.f32.partialorder %v954_v28, 0.0  ;;  %1393 = vmatmul.mubr.bf16.gmra.mrb[52].mxu1 %v1124_v40  ;;  %1684 = vmatmul.mubr.bf16.gmra.mrb[52].mxu0 %v719_v42  ;;  %v960_v59 = vadd.f32 %v959_v39, %v2847_v52 }
 0x127   : > { %v655_v56 = vmul.f32 0.2, %v547_v27  ;;  %vm1022_vm6 = vcmp.gt.f32.partialorder %v952_v29, 0.0  ;;  %v1060_v57 = vmul.f32 0.2, %v952_v29  ;;  %vm618_vm7 = vcmp.gt.f32.partialorder %v549_v31, 0.0 }
 0x128   : > { %v2962_v58 = vmul.f32 0.2, %v2953_v41  ;;  %v2966_v60 = vadd.f32 %v556_v43, %v2838_v49  ;;  %v2969_v61 = vadd.f32 %v961_v44, %v2841_v50  ;;  %vm1024_vm8 = vcmp.gt.f32.partialorder %v2956_v47, 0.0 }
 0x129   : > { %v2973_v62 = vmul.f32 0.2, %v2956_v47  ;;  %v1097_v63 = vsel %vm1021_vm3, %v950_v23, %v1059_v2  ;;  %v1099_v0 = vsel %vm1023_vm5, %v954_v28, %v1061_v46  ;;  %vm619_vm9 = vcmp.gt.f32.partialorder %v2953_v41, 0.0 }
 0x12a   : > { %vm620_vm10 = vcmp.gt.f32.partialorder %v2959_v55, 0.0  ;;  %v964_v6 = vadd.f32 %v963_v30, %v2847_v52  ;;  %v1127_v7 = vpack.c.bf16 %v1099_v0, %v1097_v63  ;;  %v694_v8 = vsel %vm618_vm7, %v549_v31, %v656_v53 }
 0x12b   : > { %v562_v3 = vpop.f32.mrb[24].mxu0  ;;  %v967_v5 = vpop.f32.mrb[24].mxu1  ;;  %v658_v12 = vmul.f32 0.2, %v2959_v55  ;;  %v559_v13 = vadd.f32 %v558_v54, %v2844_v51  ;;  %v692_v14 = vsel %vm616_vm2, %v2923_v1, %v654_v26  ;;  %v1096_v15 = vsel %vm1020_vm0, %v2918_v9, %v2931_v21 }
 0x12c   : > { %v564_v10 = vpop.f32.mrb[25].mxu0  ;;  %v969_v11 = vpop.f32.mrb[25].mxu1  ;;  %1402 = vmatprep.mubr.bf16.mxu1 %v1127_v7  ;;  %v722_v16 = vpack.c.bf16 %v694_v8, %v692_v14  ;;  %v1098_v18 = vsel %vm1022_vm6, %v952_v29, %v1060_v57  ;;  %v691_v19 = vsel %vm615_vm1, %v2915_v4, %v2927_v17  ;;  %v693_v20 = vsel %vm617_vm4, %v547_v27, %v655_v56 }
 0x12d   : > { %v566_v23 = vpop.f32.mrb[26].mxu0  ;;  %v971_v22 = vpop.f32.mrb[26].mxu1  ;;  %v1126_v24 = vpack.c.bf16 %v1098_v18, %v1096_v15  ;;  %v721_v1 = vpack.c.bf16 %v693_v20, %v691_v19  ;;  %v2995_v25 = vadd.f32 %v562_v3, %v2838_v49  ;;  %v2998_v9 = vadd.f32 %v967_v5, %v2841_v50 }
 0x12e   : > { %v568_v21 = vpop.f32.mrb[27].mxu0  ;;  %v973_v26 = vpop.f32.mrb[27].mxu1  ;;  %vm1025_vm11 = vcmp.gt.f32.partialorder %v960_v59, 0.0  ;;  %v1063_v28 = vmul.f32 0.2, %v960_v59  ;;  %1693 = vmatprep.mubr.bf16.mxu0 %v722_v16  ;;  %v3001_v4 = vadd.f32 %v564_v10, %v2844_v51  ;;  %vm621_vm12 = vcmp.gt.f32.partialorder %v2966_v60, 0.0 }
 0x12f   : > { %v1065_v29 = vmul.f32 0.2, %v964_v6  ;;  %v660_v17 = vmul.f32 0.2, %v559_v13  ;;  %vm1027_vm13 = vcmp.gt.f32.partialorder %v964_v6, 0.0  ;;  %1403 = vmatmul.mubr.bf16.gmra.mrb[56].mxu1 %v1126_v24  ;;  %1694 = vmatmul.mubr.bf16.gmra.mrb[56].mxu0 %v721_v1  ;;  %v3005_v27 = vadd.f32 %v969_v11, %v2847_v52 }
 0x130   : > { %v659_v31 = vmul.f32 0.2, %v2966_v60  ;;  %vm1026_vm14 = vcmp.gt.f32.partialorder %v2969_v61, 0.0  ;;  %v1064_v32 = vmul.f32 0.2, %v2969_v61  ;;  %vm622_vm15 = vcmp.gt.f32.partialorder %v559_v13, 0.0 }
 0x131   : > { %v3011_v33 = vmul.f32 0.2, %v2995_v25  ;;  %v3014_v34 = vmul.f32 0.2, %v2998_v9  ;;  %v3017_v35 = vadd.f32 %v566_v23, %v2838_v49  ;;  %v3020_v36 = vadd.f32 %v971_v22, %v2841_v50 }
 0x132   : > { %vm1028_vm0 = vcmp.gt.f32.partialorder %v2998_v9, 0.0  ;;  %vm624_vm1 = vcmp.gt.f32.partialorder %v3001_v4, 0.0  ;;  %v3025_v37 = vmul.f32 0.2, %v3001_v4  ;;  %v1101_v38 = vsel %vm1025_vm11, %v960_v59, %v1063_v28 }
 0x133   : > { %v1103_v39 = vsel %vm1027_vm13, %v964_v6, %v1065_v29  ;;  %v572_v40 = vpop.f32.mrb[28].mxu0  ;;  %v977_v42 = vpop.f32.mrb[28].mxu1  ;;  %vm623_vm2 = vcmp.gt.f32.partialorder %v2995_v25, 0.0  ;;  %vm1029_vm3 = vcmp.gt.f32.partialorder %v3005_v27, 0.0  ;;  %v974_v43 = vadd.f32 %v973_v26, %v2847_v52 }
 0x134   : > { %v1129_v44 = vpack.c.bf16 %v1103_v39, %v1101_v38  ;;  %v698_v2 = vsel %vm622_vm15, %v559_v13, %v660_v17  ;;  %v574_v46 = vpop.f32.mrb[29].mxu0  ;;  %v979_v54 = vpop.f32.mrb[29].mxu1  ;;  %v1067_v30 = vmul.f32 0.2, %v3005_v27  ;;  %v569_v53 = vadd.f32 %v568_v21, %v2844_v51 }
 0x135   : > { %v696_v56 = vsel %vm620_vm10, %v2959_v55, %v658_v12  ;;  %v1100_v57 = vsel %vm1024_vm8, %v2956_v47, %v2973_v62  ;;  %v1102_v63 = vsel %vm1026_vm14, %v2969_v61, %v1064_v32  ;;  %v695_v0 = vsel %vm619_vm9, %v2953_v41, %v2962_v58  ;;  %v576_v3 = vpop.f32.mrb[30].mxu0  ;;  %v981_v5 = vpop.f32.mrb[30].mxu1 }
 0x136   : > { %1412 = vmatprep.mubr.bf16.mxu1 %v1129_v44  ;;  %v724_v59 = vpack.c.bf16 %v698_v2, %v696_v56  ;;  %v697_v55 = vsel %vm621_vm12, %v2966_v60, %v659_v31  ;;  %v1128_v6 = vpack.c.bf16 %v1102_v63, %v1100_v57  ;;  %v3053_v47 = vadd.f32 %v572_v40, %v2838_v49  ;;  %v578_v61 = vpop.f32.mrb[31].mxu0  ;;  %v983_v8 = vpop.f32.mrb[31].mxu1 }
 0x137   : > { %v723_v7 = vpack.c.bf16 %v697_v55, %v695_v0  ;;  %v3056_v62 = vadd.f32 %v977_v42, %v2841_v50  ;;  %v1069_v10 = vmul.f32 0.2, %v974_v43  ;;  %v3059_v41 = vadd.f32 %v574_v46, %v2844_v51 }
 0x138   : > { %1703 = vmatprep.mubr.bf16.mxu0 %v724_v59  ;;  %v3062_v58 = vadd.f32 %v979_v54, %v2847_v52  ;;  %v3065_v60 = vadd.f32 %v576_v3, %v2838_v49  ;;  %vm625_vm4 = vcmp.gt.f32.partialorder %v3017_v35, 0.0  ;;  %v663_v11 = vmul.f32 0.2, %v3017_v35  ;;  %1413 = vmatmul.mubr.bf16.gmra.mrb[60].mxu1 %v1128_v6 }
 0x139   : > { %v664_v12 = vmul.f32 0.2, %v569_v53  ;;  %vm1031_vm5 = vcmp.gt.f32.partialorder %v974_v43, 0.0  ;;  %1704 = vmatmul.mubr.bf16.gmra.mrb[60].mxu0 %v723_v7  ;;  %v1068_v13 = vmul.f32 0.2, %v3020_v36  ;;  %vm626_vm6 = vcmp.gt.f32.partialorder %v569_v53, 0.0 }
 0x13a   : > { %v3071_v14 = vmul.f32 0.2, %v3053_v47  ;;  %v3074_v15 = vadd.f32 %v981_v5, %v2841_v50  ;;  %vm1030_vm7 = vcmp.gt.f32.partialorder %v3020_v36, 0.0  ;;  %v3078_v16 = vmul.f32 0.2, %v3056_v62 }
 0x13b   : > { %v3081_v18 = vmul.f32 0.2, %v3059_v41  ;;  %vm1033_vm8 = vcmp.gt.f32.partialorder %v3062_v58, 0.0  ;;  %vm1032_vm9 = vcmp.gt.f32.partialorder %v3056_v62, 0.0  ;;  %vm628_vm10 = vcmp.gt.f32.partialorder %v3059_v41, 0.0  ;;  %v582_v24 = vpop.f32.mrb[32].mxu0 }
 0x13c   : > { %v1071_v19 = vmul.f32 0.2, %v3062_v58  ;;  %v3088_v20 = vmul.f32 0.2, %v3065_v60  ;;  %v1105_v23 = vsel %vm1029_vm3, %v3005_v27, %v1067_v30  ;;  %v1107_v22 = vsel %vm1031_vm5, %v974_v43, %v1069_v10  ;;  %v987_v1 = vpop.f32.mrb[32].mxu1  ;;  %v584_v17 = vpop.f32.mrb[33].mxu0 }
 0x13d   : > { %vm627_vm11 = vcmp.gt.f32.partialorder %v3053_v47, 0.0  ;;  %vm629_vm12 = vcmp.gt.f32.partialorder %v3065_v60, 0.0  ;;  %v579_v21 = vadd.f32 %v578_v61, %v2844_v51  ;;  %v984_v26 = vadd.f32 %v983_v8, %v2847_v52  ;;  %v989_v31 = vpop.f32.mrb[33].mxu1 }
 0x13e   : > { %v1131_v28 = vpack.c.bf16 %v1107_v22, %v1105_v23  ;;  %v702_v29 = vsel %vm626_vm6, %v569_v53, %v664_v12  ;;  %vm1034_vm13 = vcmp.gt.f32.partialorder %v3074_v15, 0.0  ;;  %v1072_v27 = vmul.f32 0.2, %v3074_v15  ;;  %v991_v43 = vpop.f32.mrb[34].mxu1 }
 0x13f   : > { %v700_v32 = vsel %vm624_vm1, %v3001_v4, %v3025_v37  ;;  %v1104_v38 = vsel %vm1028_vm0, %v2998_v9, %v3014_v34  ;;  %v1106_v40 = vsel %vm1030_vm7, %v3020_v36, %v1068_v13  ;;  %v699_v42 = vsel %vm623_vm2, %v2995_v25, %v3011_v33  ;;  %v586_v37 = vpop.f32.mrb[34].mxu0  ;;  %v993_v46 = vpop.f32.mrb[35].mxu1 }
 0x140   : > { %1422 = vmatprep.mubr.bf16.mxu1 %v1131_v28  ;;  %v726_v39 = vpack.c.bf16 %v702_v29, %v700_v32  ;;  %v701_v4 = vsel %vm625_vm4, %v3017_v35, %v663_v11  ;;  %v1130_v44 = vpack.c.bf16 %v1106_v40, %v1104_v38  ;;  %v3120_v9 = vadd.f32 %v582_v24, %v2838_v49  ;;  %v588_v36 = vpop.f32.mrb[35].mxu0 }
 0x141   : > { %v725_v2 = vpack.c.bf16 %v701_v4, %v699_v42  ;;  %v3123_v34 = vadd.f32 %v987_v1, %v2841_v50  ;;  %vm630_vm14 = vcmp.gt.f32.partialorder %v579_v21, 0.0  ;;  %v1073_v54 = vmul.f32 0.2, %v984_v26 }
 0x142   : > { %1713 = vmatprep.mubr.bf16.mxu0 %v726_v39  ;;  %v585_v25 = vadd.f32 %v584_v17, %v2844_v51  ;;  %v990_v33 = vadd.f32 %v989_v31, %v2847_v52  ;;  %v668_v53 = vmul.f32 0.2, %v579_v21  ;;  %vm1035_vm15 = vcmp.gt.f32.partialorder %v984_v26, 0.0  ;;  %1423 = vmatmul.mubr.bf16.gmra.mrb[64].mxu1 %v1130_v44 }
 0x143   : > { %v592_v35 = vpop.f32.mrb[36].mxu0  ;;  %v997_v30 = vpop.f32.mrb[36].mxu1  ;;  %1714 = vmatmul.mubr.bf16.gmra.mrb[64].mxu0 %v725_v2  ;;  %v587_v56 = vadd.f32 %v586_v37, %v2838_v49  ;;  %v992_v57 = vadd.f32 %v991_v43, %v2841_v50  ;;  %vm631_vm0 = vcmp.gt.f32.partialorder %v3120_v9, 0.0  ;;  %v669_v59 = vmul.f32 0.2, %v3120_v9 }
 0x144   : > { %vm1036_vm1 = vcmp.gt.f32.partialorder %v3123_v34, 0.0  ;;  %v1074_v63 = vmul.f32 0.2, %v3123_v34  ;;  %vm632_vm2 = vcmp.gt.f32.partialorder %v585_v25, 0.0  ;;  %v670_v0 = vmul.f32 0.2, %v585_v25 }
 0x145   : > { %vm1037_vm3 = vcmp.gt.f32.partialorder %v990_v33, 0.0  ;;  %v1075_v55 = vmul.f32 0.2, %v990_v33  ;;  %v589_v3 = vadd.f32 %v588_v36, %v2844_v51  ;;  %v994_v5 = vadd.f32 %v993_v46, %v2847_v52  ;;  %v594_v61 = vpop.f32.mrb[37].mxu0  ;;  %v999_v8 = vpop.f32.mrb[37].mxu1 }
 0x146   : > { %v1109_v6 = vsel %vm1033_vm8, %v3062_v58, %v1071_v19  ;;  %v1111_v7 = vsel %vm1035_vm15, %v984_v26, %v1073_v54  ;;  %vm633_vm4 = vcmp.gt.f32.partialorder %v587_v56, 0.0  ;;  %v671_v10 = vmul.f32 0.2, %v587_v56  ;;  %v596_v13 = vpop.f32.mrb[38].mxu0  ;;  %v1001_v23 = vpop.f32.mrb[38].mxu1 }
 0x147   : > { %v1133_v11 = vpack.c.bf16 %v1111_v7, %v1109_v6  ;;  %v706_v12 = vsel %vm630_vm14, %v579_v21, %v668_v53  ;;  %vm1039_vm5 = vcmp.gt.f32.partialorder %v994_v5, 0.0  ;;  %v1077_v22 = vmul.f32 0.2, %v994_v5  ;;  %v1002_v26 = vpop.f32.mrb[39].mxu1 }
 0x148   : > { %v704_v24 = vsel %vm628_vm10, %v3059_v41, %v3081_v18  ;;  %v1108_v58 = vsel %vm1032_vm9, %v3056_v62, %v3078_v16  ;;  %v1110_v1 = vsel %vm1034_vm13, %v3074_v15, %v1072_v27  ;;  %v703_v21 = vsel %vm627_vm11, %v3053_v47, %v3071_v14  ;;  %v597_v18 = vpop.f32.mrb[39].mxu0 }
 0x149   : > { %1432 = vmatprep.mubr.bf16.mxu1 %v1133_v11  ;;  %v728_v19 = vpack.c.bf16 %v706_v12, %v704_v24  ;;  %v705_v41 = vsel %vm629_vm12, %v3065_v60, %v3088_v20  ;;  %v1076_v28 = vmul.f32 0.2, %v992_v57  ;;  %v672_v62 = vmul.f32 0.2, %v589_v3 }
 0x14a   : > { %v1132_v16 = vpack.c.bf16 %v1110_v1, %v1108_v58  ;;  %v727_v29 = vpack.c.bf16 %v705_v41, %v703_v21  ;;  %vm634_vm6 = vcmp.gt.f32.partialorder %v589_v3, 0.0  ;;  %v595_v15 = vadd.f32 %v594_v61, %v2844_v51 }
 0x14b   : > { %1723 = vmatprep.mubr.bf16.mxu0 %v728_v19  ;;  %v1000_v17 = vadd.f32 %v999_v8, %v2847_v52  ;;  %v1115_v31 = vsel %vm1039_vm5, %v994_v5, %v1077_v22  ;;  %vm1038_vm7 = vcmp.gt.f32.partialorder %v992_v57, 0.0  ;;  %v593_v47 = vadd.f32 %v592_v35, %v2838_v49 }
 0x14c   : > { %1433 = vmatmul.mubr.bf16.gmra.mrb[68].mxu1 %v1132_v16  ;;  %1724 = vmatmul.mubr.bf16.gmra.mrb[68].mxu0 %v727_v29  ;;  %v998_v60 = vadd.f32 %v997_v30, %v2841_v50  ;;  %v1113_v14 = vsel %vm1037_vm3, %v990_v33, %v1075_v55  ;;  %vm636_vm8 = vcmp.gt.f32.partialorder %v595_v15, 0.0  ;;  %v674_v20 = vmul.f32 0.2, %v595_v15  ;;  %v3178_v33 = vld [vmem:[%s3246_s5] sm:$0x3] }
 0x14d   : > { %vm1041_vm9 = vcmp.gt.f32.partialorder %v1000_v17, 0.0  ;;  %v1079_v27 = vmul.f32 0.2, %v1000_v17  ;;  %v1135_v32 = vpack.c.bf16 %v1115_v31, %v1113_v14  ;;  %v708_v51 = vsel %vm632_vm2, %v585_v25, %v670_v0  ;;  %v1752_v30 = vld [vmem:[%s3245_s4] sm:$0x3] }
 0x14e   : > { %v710_v52 = vsel %vm634_vm6, %v589_v3, %v672_v62  ;;  %v1112_v38 = vsel %vm1036_vm1, %v3123_v34, %v1074_v63  ;;  %v1114_v40 = vsel %vm1038_vm7, %v992_v57, %v1076_v28  ;;  %v707_v49 = vsel %vm631_vm0, %v3120_v9, %v669_v59 }
 0x14f   : > { %v730_v39 = vpack.c.bf16 %v710_v52, %v708_v51  ;;  %v709_v50 = vsel %vm633_vm4, %v587_v56, %v671_v10  ;;  %1442 = vmatprep.mubr.bf16.mxu1 %v1135_v32  ;;  %v1134_v42 = vpack.c.bf16 %v1114_v40, %v1112_v38  ;;  %v1117_v37 = vsel %vm1041_vm9, %v1000_v17, %v1079_v27 }
 0x150   : > { %v729_v4 = vpack.c.bf16 %v709_v50, %v707_v49  ;;  %v712_v43 = vsel %vm636_vm8, %v595_v15, %v674_v20  ;;  %v673_v44 = vmul.f32 0.2, %v593_v47  ;;  %v1078_v2 = vmul.f32 0.2, %v998_v60 }
 0x151   : > { %1733 = vmatprep.mubr.bf16.mxu0 %v730_v39  ;;  %v1137_v36 = vpack.c.bf16 %v1117_v37, %v1117_v37  ;;  %v732_v46 = vpack.c.bf16 %v712_v43, %v712_v43  ;;  %vm635_vm10 = vcmp.gt.f32.partialorder %v593_v47, 0.0  ;;  %vm1040_vm11 = vcmp.gt.f32.partialorder %v998_v60, 0.0 }
 0x152   : > { %v1116_v9 = vsel %vm1040_vm11, %v998_v60, %v1078_v2  ;;  %v711_v34 = vsel %vm635_vm10, %v593_v47, %v673_v44  ;;  %v1927_v35 = vrot.slane %v3178_v33, %v2835_v48  ;;  %v3186_v53 = vrot.slane %v1752_v30, %v2827_v45 }
 0x153   : > { %v1136_v54 = vpack.c.bf16 %v1116_v9, %v1116_v9  ;;  %v731_v25 = vpack.c.bf16 %v711_v34, %v711_v34  ;;  %v3189_v59 = vrot.slane %v1752_v30, %v2835_v48 }
 0x154   : > { %1443 = vmatmul.mubr.bf16.gmra.mrb[72].mxu1 %v1134_v42  ;;  %1734 = vmatmul.mubr.bf16.gmra.mrb[72].mxu0 %v729_v4 }
 0x155   : > { %1452 = vmatprep.mubr.bf16.mxu1 %v1137_v36  ;;  %1743 = vmatprep.mubr.bf16.mxu0 %v732_v46 }
 0x15c   : > { %1453 = vmatmul.mubr.bf16.gmra.mrb[76].mxu1 %v1136_v54  ;;  %1744 = vmatmul.mubr.bf16.gmra.mrb[76].mxu0 %v731_v25 }
 0x15d   : > { %1994 = vmatprep.mubr.f32.mxu1 %v1927_v35 }
 0x1de   : > { %v1364_v56 = vpop.f32.mrb[40].mxu1  ;;  %v1655_v57 = vpop.f32.mrb[40].mxu0 }
 0x1df   : > { %v1656_v63 = vadd.f32 %v1655_v57, %v1364_v56  ;;  %v1366_v0 = vpop.f32.mrb[41].mxu1  ;;  %v1657_v55 = vpop.f32.mrb[41].mxu0 }
 0x1e0   : > { %v1658_v3 = vadd.f32 %v1657_v55, %v1366_v0  ;;  %v1368_v5 = vpop.f32.mrb[42].mxu1  ;;  %v1659_v6 = vpop.f32.mrb[42].mxu0 }
 0x1e1   : > { %v1764_v7 = vadd.f32 %v3186_v53, %v1656_v63  ;;  %v1660_v61 = vadd.f32 %v1659_v6, %v1368_v5  ;;  %v1370_v8 = vpop.f32.mrb[43].mxu1  ;;  %v1661_v10 = vpop.f32.mrb[43].mxu0 }
 0x1e2   : > { %v1765_v11 = vadd.f32 %v3189_v59, %v1658_v3  ;;  %v1662_v12 = vadd.f32 %v1661_v10, %v1370_v8 }
 0x1e3   : > { %v1840_v13 = vmul.f32 0.2, %v1764_v7  ;;  %v1766_v23 = vadd.f32 %v3186_v53, %v1660_v61  ;;  %vm1802_vm12 = vcmp.gt.f32.partialorder %v1764_v7, 0.0 }
 0x1e4   : > { %v1841_v48 = vmul.f32 0.2, %v1765_v11  ;;  %v1767_v22 = vadd.f32 %v3189_v59, %v1662_v12  ;;  %vm1803_vm13 = vcmp.gt.f32.partialorder %v1765_v11, 0.0 }
 0x1e5   : > { %vm1804_vm14 = vcmp.gt.f32.partialorder %v1766_v23, 0.0  ;;  %v1842_v24 = vmul.f32 0.2, %v1766_v23  ;;  %v1878_v21 = vsel %vm1802_vm12, %v1764_v7, %v1840_v13 }
 0x1e6   : > { %vm1805_vm15 = vcmp.gt.f32.partialorder %v1767_v22, 0.0  ;;  %v1843_v58 = vmul.f32 0.2, %v1767_v22  ;;  %v1374_v19 = vpop.f32.mrb[44].mxu1  ;;  %v1665_v1 = vpop.f32.mrb[44].mxu0  ;;  %v1879_v15 = vsel %vm1803_vm13, %v1765_v11, %v1841_v48 }
 0x1e7   : > { %v1880_v41 = vsel %vm1804_vm14, %v1766_v23, %v1842_v24  ;;  %v1666_v18 = vadd.f32 %v1665_v1, %v1374_v19  ;;  %v1376_v26 = vpop.f32.mrb[45].mxu1  ;;  %v1667_v28 = vpop.f32.mrb[45].mxu0 }
 0x1e8   : > { %v1668_v62 = vadd.f32 %v1667_v28, %v1376_v26  ;;  %v1378_v16 = vpop.f32.mrb[46].mxu1  ;;  %v1669_v29 = vpop.f32.mrb[46].mxu0  ;;  %v1881_v17 = vsel %vm1805_vm15, %v1767_v22, %v1843_v58  ;;  %v2200_v31 = vpack.c.bf16 %v1880_v41, %v1878_v21 }
 0x1e9   : > { %v1768_v47 = vadd.f32 %v3186_v53, %v1666_v18  ;;  %v1670_v60 = vadd.f32 %v1669_v29, %v1378_v16  ;;  %v1380_v14 = vpop.f32.mrb[47].mxu1  ;;  %v1671_v20 = vpop.f32.mrb[47].mxu0  ;;  %v2198_v27 = vpack.c.bf16 %v1881_v17, %v1879_v15 }
 0x1ea   : > { %v1769_v32 = vadd.f32 %v3189_v59, %v1668_v62  ;;  %v1672_v51 = vadd.f32 %v1671_v20, %v1380_v14 }
 0x1eb   : > { %v1844_v52 = vmul.f32 0.2, %v1768_v47  ;;  %v1770_v38 = vadd.f32 %v3186_v53, %v1670_v60  ;;  %2199 = vmatprep.subr.bf16.mxu1 %v2198_v27  ;;  %vm1806_vm0 = vcmp.gt.f32.partialorder %v1768_v47, 0.0 }
 0x1ec   : > { %v1845_v39 = vmul.f32 0.2, %v1769_v32  ;;  %v1771_v40 = vadd.f32 %v3189_v59, %v1672_v51  ;;  %2201 = vmatpush1.bf16.xpose.msra.mxu1 %v2200_v31  ;;  %vm1807_vm1 = vcmp.gt.f32.partialorder %v1769_v32, 0.0 }
 0x1ed   : > { %vm1808_vm2 = vcmp.gt.f32.partialorder %v1770_v38, 0.0  ;;  %v1846_v49 = vmul.f32 0.2, %v1770_v38  ;;  %v1882_v42 = vsel %vm1806_vm0, %v1768_v47, %v1844_v52 }
 0x1ee   : > { %vm1809_vm3 = vcmp.gt.f32.partialorder %v1771_v40, 0.0  ;;  %v1847_v50 = vmul.f32 0.2, %v1771_v40  ;;  %v1384_v37 = vpop.f32.mrb[48].mxu1  ;;  %v1883_v44 = vsel %vm1807_vm1, %v1769_v32, %v1845_v39 }
 0x1ef   : > { %v1884_v4 = vsel %vm1808_vm2, %v1770_v38, %v1846_v49  ;;  %v1386_v43 = vpop.f32.mrb[49].mxu1 }
 0x1f0   : > { %v1885_v2 = vsel %vm1809_vm3, %v1771_v40, %v1847_v50  ;;  %v2204_v36 = vpack.c.bf16 %v1884_v4, %v1882_v42  ;;  %v1388_v46 = vpop.f32.mrb[50].mxu1 }
 0x1f1   : > { %v2202_v9 = vpack.c.bf16 %v1885_v2, %v1883_v44  ;;  %v1390_v34 = vpop.f32.mrb[51].mxu1  ;;  %v1675_v54 = vpop.f32.mrb[48].mxu0 }
 0x1f2   : > { %v1676_v25 = vadd.f32 %v1675_v54, %v1384_v37  ;;  %v1677_v35 = vpop.f32.mrb[49].mxu0 }
 0x1f3   : > { %2203 = vmatprep.subr.bf16.mxu1 %v2202_v9  ;;  %v1678_v30 = vadd.f32 %v1677_v35, %v1386_v43  ;;  %v1679_v56 = vpop.f32.mrb[50].mxu0 }
 0x1f4   : > { %2205 = vmatpush1.bf16.xpose.msra.mxu1 %v2204_v36  ;;  %v1772_v57 = vadd.f32 %v3186_v53, %v1676_v25  ;;  %v1680_v63 = vadd.f32 %v1679_v56, %v1388_v46  ;;  %v1681_v0 = vpop.f32.mrb[51].mxu0 }
 0x1f5   : > { %v1773_v55 = vadd.f32 %v3189_v59, %v1678_v30  ;;  %v1682_v3 = vadd.f32 %v1681_v0, %v1390_v34 }
 0x1f6   : > { %v1848_v5 = vmul.f32 0.2, %v1772_v57  ;;  %v1774_v6 = vadd.f32 %v3186_v53, %v1680_v63  ;;  %vm1810_vm4 = vcmp.gt.f32.partialorder %v1772_v57, 0.0 }
 0x1f7   : > { %v1849_v7 = vmul.f32 0.2, %v1773_v55  ;;  %v1775_v61 = vadd.f32 %v3189_v59, %v1682_v3  ;;  %vm1811_vm5 = vcmp.gt.f32.partialorder %v1773_v55, 0.0 }
 0x1f8   : > { %vm1812_vm6 = vcmp.gt.f32.partialorder %v1774_v6, 0.0  ;;  %v1850_v8 = vmul.f32 0.2, %v1774_v6  ;;  %v1886_v13 = vsel %vm1810_vm4, %v1772_v57, %v1848_v5 }
 0x1f9   : > { %vm1813_vm7 = vcmp.gt.f32.partialorder %v1775_v61, 0.0  ;;  %v1851_v10 = vmul.f32 0.2, %v1775_v61  ;;  %v1394_v11 = vpop.f32.mrb[52].mxu1  ;;  %v1685_v12 = vpop.f32.mrb[52].mxu0  ;;  %v1887_v21 = vsel %vm1811_vm5, %v1773_v55, %v1849_v7 }
 0x1fa   : > { %v1888_v23 = vsel %vm1812_vm6, %v1774_v6, %v1850_v8  ;;  %v1686_v48 = vadd.f32 %v1685_v12, %v1394_v11  ;;  %v1396_v22 = vpop.f32.mrb[53].mxu1  ;;  %v1687_v24 = vpop.f32.mrb[53].mxu0 }
 0x1fb   : > { %v1688_v58 = vadd.f32 %v1687_v24, %v1396_v22  ;;  %v1398_v19 = vpop.f32.mrb[54].mxu1  ;;  %v1689_v1 = vpop.f32.mrb[54].mxu0  ;;  %v1889_v41 = vsel %vm1813_vm7, %v1775_v61, %v1851_v10  ;;  %v2208_v18 = vpack.c.bf16 %v1888_v23, %v1886_v13 }
 0x1fc   : > { %v1776_v26 = vadd.f32 %v3186_v53, %v1686_v48  ;;  %v1690_v28 = vadd.f32 %v1689_v1, %v1398_v19  ;;  %v1400_v62 = vpop.f32.mrb[55].mxu1  ;;  %v1691_v16 = vpop.f32.mrb[55].mxu0  ;;  %v2206_v29 = vpack.c.bf16 %v1889_v41, %v1887_v21 }
 0x1fd   : > { %v1777_v15 = vadd.f32 %v3189_v59, %v1688_v58  ;;  %v1692_v17 = vadd.f32 %v1691_v16, %v1400_v62 }
 0x1fe   : > { %v1852_v31 = vmul.f32 0.2, %v1776_v26  ;;  %v1778_v47 = vadd.f32 %v3186_v53, %v1690_v28  ;;  %2207 = vmatprep.subr.bf16.mxu1 %v2206_v29  ;;  %vm1814_vm8 = vcmp.gt.f32.partialorder %v1776_v26, 0.0 }
 0x1ff   : > { %v1853_v60 = vmul.f32 0.2, %v1777_v15  ;;  %v1779_v14 = vadd.f32 %v3189_v59, %v1692_v17  ;;  %2209 = vmatpush1.bf16.xpose.msra.mxu1 %v2208_v18  ;;  %vm1815_vm9 = vcmp.gt.f32.partialorder %v1777_v15, 0.0 }
 0x200   : > { %vm1816_vm10 = vcmp.gt.f32.partialorder %v1778_v47, 0.0  ;;  %v1854_v20 = vmul.f32 0.2, %v1778_v47  ;;  %v1890_v32 = vsel %vm1814_vm8, %v1776_v26, %v1852_v31 }
 0x201   : > { %vm1817_vm11 = vcmp.gt.f32.partialorder %v1779_v14, 0.0  ;;  %v1855_v27 = vmul.f32 0.2, %v1779_v14  ;;  %v1891_v50 = vsel %vm1815_vm9, %v1777_v15, %v1853_v60 }
 0x202   : > { %v1892_v51 = vsel %vm1816_vm10, %v1778_v47, %v1854_v20  ;;  %v1404_v52 = vpop.f32.mrb[56].mxu1  ;;  %v1695_v38 = vpop.f32.mrb[56].mxu0 }
 0x203   : > { %v1696_v39 = vadd.f32 %v1695_v38, %v1404_v52  ;;  %v1406_v40 = vpop.f32.mrb[57].mxu1  ;;  %v1697_v49 = vpop.f32.mrb[57].mxu0  ;;  %v1893_v42 = vsel %vm1817_vm11, %v1779_v14, %v1855_v27  ;;  %v2212_v4 = vpack.c.bf16 %v1892_v51, %v1890_v32 }
 0x204   : > { %v1698_v37 = vadd.f32 %v1697_v49, %v1406_v40  ;;  %v1408_v43 = vpop.f32.mrb[58].mxu1  ;;  %v1699_v44 = vpop.f32.mrb[58].mxu0  ;;  %v2210_v2 = vpack.c.bf16 %v1893_v42, %v1891_v50 }
 0x205   : > { %v1780_v36 = vadd.f32 %v3186_v53, %v1696_v39  ;;  %v1700_v46 = vadd.f32 %v1699_v44, %v1408_v43  ;;  %v1410_v9 = vpop.f32.mrb[59].mxu1  ;;  %v1701_v34 = vpop.f32.mrb[59].mxu0 }
 0x206   : > { %v1781_v54 = vadd.f32 %v3189_v59, %v1698_v37  ;;  %v1702_v25 = vadd.f32 %v1701_v34, %v1410_v9  ;;  %2211 = vmatprep.subr.bf16.mxu1 %v2210_v2 }
 0x207   : > { %v1856_v35 = vmul.f32 0.2, %v1780_v36  ;;  %v1782_v30 = vadd.f32 %v3186_v53, %v1700_v46  ;;  %2213 = vmatpush1.bf16.xpose.msra.mxu1 %v2212_v4  ;;  %vm1818_vm12 = vcmp.gt.f32.partialorder %v1780_v36, 0.0 }
 0x208   : > { %v1857_v56 = vmul.f32 0.2, %v1781_v54  ;;  %v1783_v57 = vadd.f32 %v3189_v59, %v1702_v25  ;;  %vm1819_vm13 = vcmp.gt.f32.partialorder %v1781_v54, 0.0 }
 0x209   : > { %vm1820_vm14 = vcmp.gt.f32.partialorder %v1782_v30, 0.0  ;;  %v1858_v63 = vmul.f32 0.2, %v1782_v30  ;;  %v1894_v55 = vsel %vm1818_vm12, %v1780_v36, %v1856_v35 }
 0x20a   : > { %vm1821_vm15 = vcmp.gt.f32.partialorder %v1783_v57, 0.0  ;;  %v1859_v0 = vmul.f32 0.2, %v1783_v57  ;;  %v1895_v10 = vsel %vm1819_vm13, %v1781_v54, %v1857_v56 }
 0x20b   : > { %v1896_v3 = vsel %vm1820_vm14, %v1782_v30, %v1858_v63  ;;  %v1414_v5 = vpop.f32.mrb[60].mxu1 }
 0x20c   : > { %v1705_v6 = vpop.f32.mrb[60].mxu0  ;;  %v1416_v61 = vpop.f32.mrb[61].mxu1  ;;  %v1897_v11 = vsel %vm1821_vm15, %v1783_v57, %v1859_v0  ;;  %v2216_v12 = vpack.c.bf16 %v1896_v3, %v1894_v55 }
 0x20d   : > { %v1706_v7 = vadd.f32 %v1705_v6, %v1414_v5  ;;  %v1707_v8 = vpop.f32.mrb[61].mxu0  ;;  %v1418_v23 = vpop.f32.mrb[62].mxu1  ;;  %v2214_v22 = vpack.c.bf16 %v1897_v11, %v1895_v10 }
 0x20e   : > { %v1708_v13 = vadd.f32 %v1707_v8, %v1416_v61  ;;  %v1709_v48 = vpop.f32.mrb[62].mxu0  ;;  %v1420_v19 = vpop.f32.mrb[63].mxu1 }
 0x20f   : > { %v1784_v24 = vadd.f32 %v3186_v53, %v1706_v7  ;;  %v1710_v58 = vadd.f32 %v1709_v48, %v1418_v23  ;;  %v1711_v1 = vpop.f32.mrb[63].mxu0  ;;  %2215 = vmatprep.subr.bf16.mxu1 %v2214_v22 }
 0x210   : > { %v1785_v21 = vadd.f32 %v3189_v59, %v1708_v13  ;;  %v1712_v41 = vadd.f32 %v1711_v1, %v1420_v19  ;;  %2217 = vmatpush1.bf16.xpose.msra.mxu1 %v2216_v12 }
 0x211   : > { %v1860_v18 = vmul.f32 0.2, %v1784_v24  ;;  %v1786_v26 = vadd.f32 %v3186_v53, %v1710_v58  ;;  %vm1822_vm0 = vcmp.gt.f32.partialorder %v1784_v24, 0.0 }
 0x212   : > { %v1861_v28 = vmul.f32 0.2, %v1785_v21  ;;  %v1787_v62 = vadd.f32 %v3189_v59, %v1712_v41  ;;  %vm1823_vm1 = vcmp.gt.f32.partialorder %v1785_v21, 0.0 }
 0x213   : > { %vm1824_vm2 = vcmp.gt.f32.partialorder %v1786_v26, 0.0  ;;  %v1862_v16 = vmul.f32 0.2, %v1786_v26  ;;  %v1898_v15 = vsel %vm1822_vm0, %v1784_v24, %v1860_v18 }
 0x214   : > { %vm1825_vm3 = vcmp.gt.f32.partialorder %v1787_v62, 0.0  ;;  %v1863_v29 = vmul.f32 0.2, %v1787_v62  ;;  %v1899_v27 = vsel %vm1823_vm1, %v1785_v21, %v1861_v28 }
 0x215   : > { %v1900_v17 = vsel %vm1824_vm2, %v1786_v26, %v1862_v16  ;;  %v1424_v31 = vpop.f32.mrb[64].mxu1  ;;  %vm2022_vm2 = vcmask 195584  }
 0x216   : > { %v1715_v47 = vpop.f32.mrb[64].mxu0  ;;  %v1426_v14 = vpop.f32.mrb[65].mxu1  ;;  %v1901_v32 = vsel %vm1825_vm3, %v1787_v62, %v1863_v29  ;;  %v2220_v51 = vpack.c.bf16 %v1900_v17, %v1898_v15 }
 0x217   : > { %v1716_v60 = vadd.f32 %v1715_v47, %v1424_v31  ;;  %v1717_v20 = vpop.f32.mrb[65].mxu0  ;;  %v1428_v38 = vpop.f32.mrb[66].mxu1  ;;  %v2218_v40 = vpack.c.bf16 %v1901_v32, %v1899_v27 }
 0x218   : > { %v1718_v52 = vadd.f32 %v1717_v20, %v1426_v14  ;;  %v1719_v39 = vpop.f32.mrb[66].mxu0  ;;  %v1430_v42 = vpop.f32.mrb[67].mxu1 }
 0x219   : > { %v1788_v49 = vadd.f32 %v3186_v53, %v1716_v60  ;;  %v1720_v50 = vadd.f32 %v1719_v39, %v1428_v38  ;;  %v1721_v4 = vpop.f32.mrb[67].mxu0  ;;  %2219 = vmatprep.subr.bf16.mxu1 %v2218_v40 }
 0x21a   : > { %v1789_v37 = vadd.f32 %v3189_v59, %v1718_v52  ;;  %v1722_v43 = vadd.f32 %v1721_v4, %v1430_v42  ;;  %2221 = vmatpush1.bf16.xpose.msra.mxu1 %v2220_v51 }
 0x21b   : > { %v1864_v44 = vmul.f32 0.2, %v1788_v49  ;;  %v1790_v2 = vadd.f32 %v3186_v53, %v1720_v50  ;;  %vm1826_vm4 = vcmp.gt.f32.partialorder %v1788_v49, 0.0 }
 0x21c   : > { %v1865_v36 = vmul.f32 0.2, %v1789_v37  ;;  %v1791_v46 = vadd.f32 %v3189_v59, %v1722_v43  ;;  %vm1827_vm5 = vcmp.gt.f32.partialorder %v1789_v37, 0.0 }
 0x21d   : > { %vm1828_vm6 = vcmp.gt.f32.partialorder %v1790_v2, 0.0  ;;  %v1866_v9 = vmul.f32 0.2, %v1790_v2  ;;  %v1902_v54 = vsel %vm1826_vm4, %v1788_v49, %v1864_v44 }
 0x21e   : > { %vm1829_vm7 = vcmp.gt.f32.partialorder %v1791_v46, 0.0  ;;  %v1867_v34 = vmul.f32 0.2, %v1791_v46  ;;  %v1903_v0 = vsel %vm1827_vm5, %v1789_v37, %v1865_v36 }
 0x21f   : > { %v1904_v25 = vsel %vm1828_vm6, %v1790_v2, %v1866_v9  ;;  %v1434_v35 = vpop.f32.mrb[68].mxu1  ;;  %v1725_v30 = vpop.f32.mrb[68].mxu0 }
 0x220   : > { %v1726_v56 = vadd.f32 %v1725_v30, %v1434_v35  ;;  %v1436_v57 = vpop.f32.mrb[69].mxu1  ;;  %v1727_v63 = vpop.f32.mrb[69].mxu0  ;;  %v1905_v55 = vsel %vm1829_vm7, %v1791_v46, %v1867_v34  ;;  %v2224_v3 = vpack.c.bf16 %v1904_v25, %v1902_v54 }
 0x221   : > { %v1728_v5 = vadd.f32 %v1727_v63, %v1436_v57  ;;  %v1438_v6 = vpop.f32.mrb[70].mxu1  ;;  %v1729_v7 = vpop.f32.mrb[70].mxu0  ;;  %v2222_v61 = vpack.c.bf16 %v1905_v55, %v1903_v0 }
 0x222   : > { %v1792_v8 = vadd.f32 %v3186_v53, %v1726_v56  ;;  %v1730_v10 = vadd.f32 %v1729_v7, %v1438_v6  ;;  %v1440_v11 = vpop.f32.mrb[71].mxu1  ;;  %v1731_v12 = vpop.f32.mrb[71].mxu0 }
 0x223   : > { %v1793_v13 = vadd.f32 %v3189_v59, %v1728_v5  ;;  %v1732_v23 = vadd.f32 %v1731_v12, %v1440_v11  ;;  %2223 = vmatprep.subr.bf16.mxu1 %v2222_v61 }
 0x224   : > { %v1868_v48 = vmul.f32 0.2, %v1792_v8  ;;  %v1794_v22 = vadd.f32 %v3186_v53, %v1730_v10  ;;  %2225 = vmatpush1.bf16.xpose.msra.mxu1 %v2224_v3  ;;  %vm1830_vm8 = vcmp.gt.f32.partialorder %v1792_v8, 0.0  ;;  %v1918_v10 = vstv %s1917_s16 }
 0x225   : > { %v1869_v24 = vmul.f32 0.2, %v1793_v13  ;;  %v1795_v58 = vadd.f32 %v3189_v59, %v1732_v23  ;;  %vm1831_vm9 = vcmp.gt.f32.partialorder %v1793_v13, 0.0 }
 0x226   : > { %vm1832_vm10 = vcmp.gt.f32.partialorder %v1794_v22, 0.0  ;;  %v1870_v19 = vmul.f32 0.2, %v1794_v22  ;;  %v1906_v18 = vsel %vm1830_vm8, %v1792_v8, %v1868_v48  ;;  %v1923_v8 = vrot.slane %v3178_v33, %v2827_v45 }
 0x227   : > { %vm1833_vm11 = vcmp.gt.f32.partialorder %v1795_v58, 0.0  ;;  %v1871_v1 = vmul.f32 0.2, %v1795_v58  ;;  %v1444_v21 = vpop.f32.mrb[72].mxu1  ;;  %v1735_v41 = vpop.f32.mrb[72].mxu0  ;;  %v1907_v31 = vsel %vm1831_vm9, %v1793_v13, %v1869_v24 }
 0x228   : > { %v1908_v26 = vsel %vm1832_vm10, %v1794_v22, %v1870_v19  ;;  %v1736_v28 = vadd.f32 %v1735_v41, %v1444_v21  ;;  %v1446_v62 = vpop.f32.mrb[73].mxu1  ;;  %v1737_v16 = vpop.f32.mrb[73].mxu0 }
 0x229   : > { %v1738_v29 = vadd.f32 %v1737_v16, %v1446_v62  ;;  %v1448_v15 = vpop.f32.mrb[74].mxu1  ;;  %v1739_v17 = vpop.f32.mrb[74].mxu0  ;;  %v1909_v47 = vsel %vm1833_vm11, %v1795_v58, %v1871_v1  ;;  %v2228_v60 = vpack.c.bf16 %v1908_v26, %v1906_v18 }
 0x22a   : > { %v1796_v14 = vadd.f32 %v3186_v53, %v1736_v28  ;;  %v1740_v20 = vadd.f32 %v1739_v17, %v1448_v15  ;;  %v1450_v27 = vpop.f32.mrb[75].mxu1  ;;  %v1741_v32 = vpop.f32.mrb[75].mxu0  ;;  %v2226_v51 = vpack.c.bf16 %v1909_v47, %v1907_v31 }
 0x22b   : > { %v1797_v52 = vadd.f32 %v3189_v59, %v1738_v29  ;;  %v1742_v38 = vadd.f32 %v1741_v32, %v1450_v27 }
 0x22c   : > { %v1872_v39 = vmul.f32 0.2, %v1796_v14  ;;  %v1798_v40 = vadd.f32 %v3186_v53, %v1740_v20  ;;  %2227 = vmatprep.subr.bf16.mxu1 %v2226_v51  ;;  %vm1834_vm12 = vcmp.gt.f32.partialorder %v1796_v14, 0.0 }
 0x22d   : > { %v1873_v49 = vmul.f32 0.2, %v1797_v52  ;;  %v1799_v50 = vadd.f32 %v3189_v59, %v1742_v38  ;;  %2229 = vmatpush1.bf16.xpose.msra.mxu1 %v2228_v60  ;;  %vm1835_vm13 = vcmp.gt.f32.partialorder %v1797_v52, 0.0 }
 0x22e   : > { %vm1836_vm14 = vcmp.gt.f32.partialorder %v1798_v40, 0.0  ;;  %v1874_v42 = vmul.f32 0.2, %v1798_v40  ;;  %v1910_v44 = vsel %vm1834_vm12, %v1796_v14, %v1872_v39 }
 0x22f   : > { %vm1837_vm15 = vcmp.gt.f32.partialorder %v1799_v50, 0.0  ;;  %v1875_v4 = vmul.f32 0.2, %v1799_v50  ;;  %v1454_v37 = vpop.f32.mrb[76].mxu1  ;;  %v1745_v43 = vpop.f32.mrb[76].mxu0  ;;  %v1911_v35 = vsel %vm1835_vm13, %v1797_v52, %v1873_v49 }
 0x230   : > { %v1912_v2 = vsel %vm1836_vm14, %v1798_v40, %v1874_v42  ;;  %v1746_v36 = vadd.f32 %v1745_v43, %v1454_v37  ;;  %v1456_v46 = vpop.f32.mrb[77].mxu1  ;;  %v1747_v9 = vpop.f32.mrb[77].mxu0 }
 0x231   : > { %v1748_v34 = vadd.f32 %v1747_v9, %v1456_v46  ;;  %v1458_v54 = vpop.f32.mrb[78].mxu1  ;;  %v1749_v25 = vpop.f32.mrb[78].mxu0  ;;  %v1913_v30 = vsel %vm1837_vm15, %v1799_v50, %v1875_v4  ;;  %v2232_v56 = vpack.c.bf16 %v1912_v2, %v1910_v44 }
 0x232   : > { %v1459_v57 = vpop.f32.mrb[79].mxu1  ;;  %v1750_v63 = vpop.f32.mrb[79].mxu0  ;;  %v2230_v0 = vpack.c.bf16 %v1913_v30, %v1911_v35  ;;  %v1800_v3 = vadd.f32 %v3186_v53, %v1746_v36 }
 0x233   : > { %v1801_v55 = vadd.f32 %v3189_v59, %v1748_v34 }
 0x234   : > { %2231 = vmatprep.subr.bf16.mxu1 %v2230_v0  ;;  %v1876_v7 = vmul.f32 0.2, %v1800_v3  ;;  %vm1838_vm1 = vcmp.gt.f32.partialorder %v1800_v3, 0.0 }
 0x235   : > { %2233 = vmatpush1.bf16.xpose.msra.mxu1 %v2232_v56  ;;  %vm1839_vm0 = vcmp.gt.f32.partialorder %v1801_v55, 0.0  ;;  %v1877_v5 = vmul.f32 0.2, %v1801_v55 }
 0x236   : > { %v1914_v61 = vsel %vm1838_vm1, %v1800_v3, %v1876_v7 }
 0x237   : > { %v1915_v6 = vsel %vm1839_vm0, %v1801_v55, %v1877_v5 }
 0x238   : > { %1966 = vmatprep.subr.mxu1 %v1915_v6 }
 0x23d   : > { %1967 = vmatpush1.xpose.msra.mxu1 %v1914_v61 }
 0x240   : > { %1995 = vmatmul.mubr.f32.vlgmr.msra.gmra.mrb[80].mxu1 %v1923_v8 }
 0x313   : > { %v1996_v59 = vpop.f32.mrb[80].mxu1 }
 0x314   : > { %v1997_v53 = vadd.f32 %v1996_v59, %v1918_v10  ;;  %v1998_v11 = vpop.f32.mrb[81].mxu1 }
 0x315   : > { %v1999_v12 = vadd.f32 %v1998_v11, %v1918_v10 }
 0x316   : > { %v2193_v13 = vmul.f32 -1.442695, %v1997_v53 }
 0x317   : > { %v2194_v23 = vmul.f32 -1.442695, %v1999_v12 }
 0x318   : > { %2433 = vpow2.f32 %v2193_v13 }
 0x319   : > { %2435 = vpow2.f32 %v2194_v23 }
 0x322   : > { %v2434_v48 = vpop.eup %2433 }
 0x323   : > { %v2436_v22 = vpop.eup %2435  ;;  %v2007_v24 = vadd.f32 1.0, %v2434_v48 }
 0x324   : > { %v2008_v58 = vadd.f32 1.0, %v2436_v22 }
 0x325   : > { %2437 = vrcp.f32 %v2007_v24 }
 0x326   : > { %2439 = vrcp.f32 %v2008_v58 }
 0x32f   : > { %v2438_v33 = vpop.eup %2437 }
 0x330   : > { %v2440_v19 = vpop.eup %2439  ;;  %v2016_v1 = vrot.slane %v2438_v33, %v2827_v45 }
 0x331   : > { %v2020_v21 = vrot.slane %v2440_v19, %v2827_v45 }
 0x332   : > { %2021 = vst [vmem:[%s281_s21] sm:$0xff] %v2016_v1 }
 0x333   : > { %2023 = vst.msk [vmem:[%s281_s21 + $0x8] sm:$0xff] %vm2022_vm2, %v2020_v21 }
 0x334 PF: > { %s18_s26 = sadd.s32 1, %s2447_s26  }
 0x335   : > { %p15_p5 = scmp.ge.s32.totalorder %s18_s26, 4  }
 0x337   :  { %17 = sbr.rel (!%p15_p5) target bundleno = 2 (0x2), region = 78 }

</bundles_post_ra>
